<compile_context>
chip_gen: v5e
topology: v5e:2x2
jax: 0.10.0
libtpu: 0.0.40
codegen_flags: <defaults>
</compile_context>

<pallas_src>
import functools

import jax
import jax.numpy as jnp
from jax import lax
from jax.experimental import pallas as pl
from jax.experimental.pallas import tpu as pltpu


# ----------------------------------------------------------------------------
# Pallas kernel: full bidirectional single-layer LSTM over the sequence.
# ----------------------------------------------------------------------------
def _bilstm_kernel(x_ref,      # (T*B, 2D)  bf16  rows = [x[t] | x[T-1-t]]
                   wih_ref,    # (2D, 8H)   bf16  block-sparse, gate-interleaved
                   whh_ref,    # (2H, 8H)   bf16  block-diagonal, gate-interleaved
                   b_ref,      # (1, 8H)    f32   combined biases
                   out_ref,    # (T*B, 2H)  f32   [:, :H]=fwd @ t, [:, H:]=bwd @ step t
                   gx_ref,     # scratch (T*B, 8H) f32
                   *, T, B, H):
    # ---- hoisted input projection: one big MXU matmul for every timestep,
    #      both directions (backward half already time-reversed via x_cat),
    #      plus biases — entirely off the serial critical path. ---------------
    gx_ref[...] = (
        jnp.dot(x_ref[...], wih_ref[...], preferred_element_type=jnp.float32)
        + b_ref[...])

    whh = whh_ref[...]                                    # (2H, 8H) bf16

    def step(t, carry):
        h, c = carry                   # (B, 2H) f32; [:, :H]=fwd, [:, H:]=bwd

        # one recurrent MXU matmul for both directions (block-diagonal Whh)
        gr = jnp.dot(h.astype(jnp.bfloat16), whh,
                     preferred_element_type=jnp.float32)           # (B, 8H)

        # single contiguous pre-activation load (no select, no second load)
        gates = gr + gx_ref[pl.ds(t * B, B), :]                     # (B, 8H)

        # fused activations: one sigmoid over i/f/o (6H lanes), one tanh (2H)
        sig = jax.nn.sigmoid(gates[:, :6 * H])
        i_all = sig[:, 0:2 * H]
        f_all = sig[:, 2 * H:4 * H]
        o_all = sig[:, 4 * H:6 * H]
        g_all = jnp.tanh(gates[:, 6 * H:8 * H])

        c_new = f_all * c + i_all * g_all                          # (B, 2H)
        h_new = o_all * jnp.tanh(c_new)                            # (B, 2H)

        # ONE contiguous store per step; fwd/bwd untangling happens in the
        # wrapper (folded into the transpose that already exists there).
        out_ref[pl.ds(t * B, B), :] = h_new
        return h_new, c_new

    h0 = jnp.zeros((B, 2 * H), jnp.float32)
    c0 = jnp.zeros((B, 2 * H), jnp.float32)
    # bounded unroll: full LLO visibility for short T, no code/vreg blowup at
    # large T.
    lax.fori_loop(0, T, step, (h0, c0), unroll=min(T, 8))


# ----------------------------------------------------------------------------
# Weight preparation: permute / fuse PyTorch LSTM weights into kernel layout.
# ----------------------------------------------------------------------------
def _prep_weights(params, D, H):
    """Returns:
       wih_cat: (2D, 8H) bf16  rows 0:D feed forward gate columns (from x[t]),
                               rows D:2D feed backward gate columns (from
                               x[T-1-t]); other blocks are zero.
       whh_bd : (2H, 8H) bf16  block-diagonal recurrent weights.
       b_cat  : (1, 8H)  f32   combined (b_ih + b_hh) biases.
    Gate column order: [i_f, i_b, f_f, f_b, o_f, o_b, g_f, g_b]
    """
    (wih_f, whh_f, bih_f, bhh_f, wih_b, whh_b, bih_b, bhh_b) = params

    def split_cols(w_t):
        # w_t: (., 4H) with PyTorch gate-column order [i, f, g, o] -> i, f, o, g
        return (w_t[:, 0:H], w_t[:, H:2 * H],
                w_t[:, 3 * H:4 * H], w_t[:, 2 * H:3 * H])

    fi, ff, fo, fg = split_cols(wih_f.T)                   # (D, H) each
    bi, bf_, bo, bg = split_cols(wih_b.T)
    zD = jnp.zeros((D, H), jnp.float32)
    top = jnp.concatenate([fi, zD, ff, zD, fo, zD, fg, zD], axis=1)   # (D, 8H)
    bot = jnp.concatenate([zD, bi, zD, bf_, zD, bo, zD, bg], axis=1)  # (D, 8H)
    wih_cat = jnp.concatenate([top, bot], axis=0)          # (2D, 8H)

    hfi, hff, hfo, hfg = split_cols(whh_f.T)               # (H, H) each
    hbi, hbf, hbo, hbg = split_cols(whh_b.T)
    zH = jnp.zeros((H, H), jnp.float32)
    row_f = jnp.concatenate([hfi, zH, hff, zH, hfo, zH, hfg, zH], axis=1)
    row_b = jnp.concatenate([zH, hbi, zH, hbf, zH, hbo, zH, hbg], axis=1)
    whh_bd = jnp.concatenate([row_f, row_b], axis=0)       # (2H, 8H)

    def split_vec(b):
        return b[0:H], b[H:2 * H], b[3 * H:4 * H], b[2 * H:3 * H]

    cfi, cff, cfo, cfg = split_vec(bih_f + bhh_f)
    cbi, cbf, cbo, cbg = split_vec(bih_b + bhh_b)
    b_cat = jnp.concatenate([cfi, cbi, cff, cbf, cfo, cbo, cfg, cbg])

    return (wih_cat.astype(jnp.bfloat16),
            whh_bd.astype(jnp.bfloat16),
            b_cat.reshape(1, 8 * H).astype(jnp.float32))


def _vmem_limit_bytes(T, B, D, H):
    """Padded resident-VMEM estimate (no grid => whole arrays live in VMEM)."""
    def pad(n, m):
        return ((n + m - 1) // m) * m
    rows = pad(T * B, 8)
    total = 0
    total += rows * pad(2 * D, 128) * 2            # x_cat        bf16
    total += pad(2 * D, 16) * pad(8 * H, 128) * 2  # wih_cat      bf16
    total += pad(2 * H, 16) * pad(8 * H, 128) * 2  # whh_bd       bf16
    total += 8 * pad(8 * H, 128) * 4               # bias         f32
    total += rows * pad(2 * H, 128) * 4            # out          f32
    total += rows * pad(8 * H, 128) * 4            # gx scratch   f32
    # 2x safety factor + fixed headroom for compiler-internal scratch.
    return min(2 * total + (8 << 20), 128 << 20)


def _bilstm_pallas(x_tm, params, hidden):
    """x_tm: (T, B, D) time-major f32.
    Returns (T, B, 2H) f32 where [..., :H] is the forward hidden at time t and
    [..., H:] is the backward hidden at processed step t (actual time T-1-t).
    """
    T, B, D = x_tm.shape
    H = hidden
    wih_cat, whh_bd, b_cat = _prep_weights(params, D, H)

    # Pre-apply the backward-direction time reversal off the critical path:
    # each row t carries both x[t] (fwd columns) and x[T-1-t] (bwd columns).
    x_cat = jnp.concatenate([x_tm, x_tm[::-1]], axis=-1)       # (T, B, 2D)
    x_flat = x_cat.reshape(T * B, 2 * D).astype(jnp.bfloat16)

    vmem = pl.BlockSpec(memory_space=pltpu.MemorySpace.VMEM)
    out = pl.pallas_call(
        functools.partial(_bilstm_kernel, T=T, B=B, H=H),
        out_shape=jax.ShapeDtypeStruct((T * B, 2 * H), jnp.float32),
        in_specs=[vmem] * 4,
        out_specs=vmem,
        scratch_shapes=[pltpu.VMEM((T * B, 8 * H), jnp.float32)],
        compiler_params=pltpu.CompilerParams(
            vmem_limit_bytes=_vmem_limit_bytes(T, B, D, H)),
    )(x_flat, wih_cat, whh_bd, b_cat)
    return out.reshape(T, B, 2 * H)


# ----------------------------------------------------------------------------
# Module wrapper: reproduces LSTM_rnn.forward
# ----------------------------------------------------------------------------
@functools.partial(jax.jit, static_argnums=(2,))
def lstm_rnn_forward(x, params, hidden):
    # x: (B, C, V, T)
    B, C, V, T = x.shape
    D = C * V
    H = hidden
    # x.permute(0,3,1,2).view(B, T, C*V), then time-major for the kernel
    x_seq = jnp.transpose(x, (0, 3, 1, 2)).reshape(B, T, D)
    x_tm = jnp.transpose(x_seq, (1, 0, 2))                   # (T, B, D)

    out_k = _bilstm_pallas(x_tm, params, hidden)             # (T, B, 2H)
    # Backward half was produced in processing order (step t == time T-1-t);
    # reverse it here and fuse with the batch-major transpose.
    out_tb = jnp.concatenate([out_k[:, :, :H], out_k[::-1, :, H:]], axis=-1)
    out = jnp.transpose(out_tb, (1, 0, 2))                   # (B, T, 2H)

    # out.view(B, T, C, V).permute(0, 2, 3, 1)  (needs 2H == C*V)
    out = out.reshape(B, T, C, V).transpose(0, 2, 3, 1)      # (B, C, V, T)
    return out


# ----------------------------------------------------------------------------
# Pure-JAX reference (lax.scan, f32 HIGHEST precision) for correctness check.
# ----------------------------------------------------------------------------
def lstm_rnn_reference(x, params, hidden):
    B, C, V, T = x.shape
    D = C * V
    H = hidden
    (wih_f, whh_f, bih_f, bhh_f, wih_b, whh_b, bih_b, bhh_b) = params
    x_seq = jnp.transpose(x, (0, 3, 1, 2)).reshape(B, T, D)
    xs = jnp.transpose(x_seq, (1, 0, 2))                     # (T, B, D)

    def cell(wih, whh, b, carry, x_t):
        h, c = carry
        gates = (jnp.matmul(x_t, wih.T, precision=lax.Precision.HIGHEST)
                 + jnp.matmul(h, whh.T, precision=lax.Precision.HIGHEST) + b)
        i, f, g, o = jnp.split(gates, 4, axis=-1)
        i, f, g, o = jax.nn.sigmoid(i), jax.nn.sigmoid(f), jnp.tanh(g), jax.nn.sigmoid(o)
        c = f * c + i * g
        h = o * jnp.tanh(c)
        return (h, c), h

    h0 = jnp.zeros((B, H), jnp.float32)
    c0 = jnp.zeros((B, H), jnp.float32)
    _, out_f = lax.scan(lambda cr, xt: cell(wih_f, whh_f, bih_f + bhh_f, cr, xt),
                        (h0, c0), xs)
    _, out_b = lax.scan(lambda cr, xt: cell(wih_b, whh_b, bih_b + bhh_b, cr, xt),
                        (h0, c0), xs[::-1])
    out_b = out_b[::-1]
    out = jnp.transpose(jnp.concatenate([out_f, out_b], axis=-1), (1, 0, 2))
    return out.reshape(B, T, C, V).transpose(0, 2, 3, 1)


def init_params(key, in_size, hidden):
    """PyTorch nn.LSTM-style params for layer 0, forward + reverse directions."""
    H = hidden
    k = 1.0 / jnp.sqrt(jnp.float32(H))
    keys = jax.random.split(key, 8)
    shapes = [(4 * H, in_size), (4 * H, H), (4 * H,), (4 * H,),   # forward
              (4 * H, in_size), (4 * H, H), (4 * H,), (4 * H,)]   # reverse
    return tuple(jax.random.uniform(kk, s, jnp.float32, -k, k)
                 for kk, s in zip(keys, shapes))


if __name__ == "__main__":
    B, C, V, T = 2, 4, 16, 8
    hidden = 32                       # 2 * hidden == C * V == 64
    in_size = C * V

    key = jax.random.PRNGKey(0)
    kx, kp = jax.random.split(key)
    x = jax.random.normal(kx, (B, C, V, T), dtype=jnp.float32)
    params = init_params(kp, in_size, hidden)

    out = lstm_rnn_forward(x, params, hidden)
    out = jax.block_until_ready(out)

    ref = jax.block_until_ready(lstm_rnn_reference(x, params, hidden))
    assert out.shape == (B, C, V, T), out.shape
    # bf16 MXU operands with f32 accumulation (deliberate) -> relaxed tolerance
    # vs the f32 HIGHEST-precision reference.  Note: the per-step h -> bf16
    # cast compounds with T; re-validate tolerance before scaling T.
    max_err = float(jnp.max(jnp.abs(out - ref)))
    assert max_err < 2e-2, max_err

    print("KERNEL_OK")
</pallas_src>

<mosaic_0001>
module attributes {stable_mosaic.version = 11 : i64} {
  func.func @_bilstm_kernel(%arg0: memref<16x128xbf16, #tpu.memory_space<vmem>>, %arg1: memref<128x256xbf16, #tpu.memory_space<vmem>>, %arg2: memref<64x256xbf16, #tpu.memory_space<vmem>>, %arg3: memref<1x256xf32, #tpu.memory_space<vmem>>, %arg4: memref<16x64xf32, #tpu.memory_space<vmem>>, %arg5: memref<16x256xf32, #tpu.memory_space<vmem>>) attributes {dimension_semantics = [], scalar_prefetch = 0 : i64, scratch_operands = 1 : i64, tpu.core_type = #tpu.core_type<tc>} {
    %c0 = arith.constant 0 : index
    %c0_0 = arith.constant 0 : index
    %0 = vector.load %arg0[%c0, %c0_0] : memref<16x128xbf16, #tpu.memory_space<vmem>>, vector<16x128xbf16>
    %c0_1 = arith.constant 0 : index
    %c0_2 = arith.constant 0 : index
    %1 = vector.load %arg1[%c0_1, %c0_2] : memref<128x256xbf16, #tpu.memory_space<vmem>>, vector<128x256xbf16>
    %cst = arith.constant dense<0.000000e+00> : vector<16x256xf32>
    %2 = tpu.matmul %0, %1, %cst {dimension_numbers = #tpu.dot_dimension_numbers<[1], [0], [0], [1], [0, 0, 1, 1], [], []>} : vector<16x128xbf16>, vector<128x256xbf16>, vector<16x256xf32> -> vector<16x256xf32>
    %c0_3 = arith.constant 0 : index
    %c0_4 = arith.constant 0 : index
    %3 = vector.load %arg3[%c0_3, %c0_4] : memref<1x256xf32, #tpu.memory_space<vmem>>, vector<1x256xf32>
    %4 = vector.broadcast %3 : vector<1x256xf32> to vector<16x256xf32>
    %5 = arith.addf %2, %4 : vector<16x256xf32>
    %c0_5 = arith.constant 0 : index
    %c0_6 = arith.constant 0 : index
    %6 = vector.load %arg5[%c0_5, %c0_6] : memref<16x256xf32, #tpu.memory_space<vmem>>, vector<16x256xf32>
    tpu.vector_store %arg5[%c0_5, %c0_6], %5 {strides = array<i32>} : memref<16x256xf32, #tpu.memory_space<vmem>>, vector<16x256xf32>,
    %c0_7 = arith.constant 0 : index
    %c0_8 = arith.constant 0 : index
    %7 = vector.load %arg2[%c0_7, %c0_8] : memref<64x256xbf16, #tpu.memory_space<vmem>>, vector<64x256xbf16>
    %cst_9 = arith.constant 0.000000e+00 : f32
    %8 = vector.broadcast %cst_9 : f32 to vector<2x64xf32>
    %cst_10 = arith.constant 0.000000e+00 : f32
    %9 = vector.broadcast %cst_10 : f32 to vector<2x64xf32>
    %c0_i32 = arith.constant 0 : i32
    %10 = arith.truncf %8 : vector<2x64xf32> to vector<2x64xbf16>
    %cst_11 = arith.constant dense<0.000000e+00> : vector<2x256xf32>
    %11 = tpu.matmul %10, %7, %cst_11 {dimension_numbers = #tpu.dot_dimension_numbers<[1], [0], [0], [1], [0, 0, 1, 1], [], []>} : vector<2x64xbf16>, vector<64x256xbf16>, vector<2x256xf32> -> vector<2x256xf32>
    %c2_i32 = arith.constant 2 : i32
    %12 = arith.muli %c0_i32, %c2_i32 : i32
    %13 = arith.index_cast %12 : i32 to index
    %c0_12 = arith.constant 0 : index
    %14 = vector.load %arg5[%13, %c0_12] : memref<16x256xf32, #tpu.memory_space<vmem>>, vector<2x256xf32>
    %15 = arith.addf %11, %14 : vector<2x256xf32>
    %16 = vector.extract_strided_slice %15 {offsets = [0, 0], sizes = [2, 192], strides = [1, 1]} : vector<2x256xf32> to vector<2x192xf32>
    %17 = arith.negf %16 : vector<2x192xf32>
    %18 = math.exp %17 : vector<2x192xf32>
    %cst_13 = arith.constant 1.000000e+00 : f32
    %19 = vector.broadcast %cst_13 : f32 to vector<2x192xf32>
    %20 = arith.addf %19, %18 : vector<2x192xf32>
    %21 = arith.divf %19, %20 : vector<2x192xf32>
    %22 = vector.extract_strided_slice %21 {offsets = [0, 0], sizes = [2, 64], strides = [1, 1]} : vector<2x192xf32> to vector<2x64xf32>
    %23 = vector.extract_strided_slice %21 {offsets = [0, 64], sizes = [2, 64], strides = [1, 1]} : vector<2x192xf32> to vector<2x64xf32>
    %24 = vector.extract_strided_slice %21 {offsets = [0, 128], sizes = [2, 64], strides = [1, 1]} : vector<2x192xf32> to vector<2x64xf32>
    %25 = vector.extract_strided_slice %15 {offsets = [0, 192], sizes = [2, 64], strides = [1, 1]} : vector<2x256xf32> to vector<2x64xf32>
    %26 = math.tanh %25 : vector<2x64xf32>
    %27 = arith.mulf %23, %9 : vector<2x64xf32>
    %28 = arith.mulf %22, %26 : vector<2x64xf32>
    %29 = arith.addf %27, %28 : vector<2x64xf32>
    %30 = math.tanh %29 : vector<2x64xf32>
    %31 = arith.mulf %24, %30 : vector<2x64xf32>
    %c2_i32_14 = arith.constant 2 : i32
    %32 = arith.muli %c0_i32, %c2_i32_14 : i32
    %33 = arith.index_cast %32 : i32 to index
    %c0_15 = arith.constant 0 : index
    %34 = vector.load %arg4[%33, %c0_15] : memref<16x64xf32, #tpu.memory_space<vmem>>, vector<2x64xf32>
    tpu.vector_store %arg4[%33, %c0_15], %31 {strides = array<i32>} : memref<16x64xf32, #tpu.memory_space<vmem>>, vector<2x64xf32>,
    %c1_i32 = arith.constant 1 : i32
    %35 = arith.truncf %31 : vector<2x64xf32> to vector<2x64xbf16>
    %cst_16 = arith.constant dense<0.000000e+00> : vector<2x256xf32>
    %36 = tpu.matmul %35, %7, %cst_16 {dimension_numbers = #tpu.dot_dimension_numbers<[1], [0], [0], [1], [0, 0, 1, 1], [], []>} : vector<2x64xbf16>, vector<64x256xbf16>, vector<2x256xf32> -> vector<2x256xf32>
    %c2_i32_17 = arith.constant 2 : i32
    %37 = arith.muli %c1_i32, %c2_i32_17 : i32
    %38 = arith.index_cast %37 : i32 to index
    %c0_18 = arith.constant 0 : index
    %39 = vector.load %arg5[%38, %c0_18] : memref<16x256xf32, #tpu.memory_space<vmem>>, vector<2x256xf32>
    %40 = arith.addf %36, %39 : vector<2x256xf32>
    %41 = vector.extract_strided_slice %40 {offsets = [0, 0], sizes = [2, 192], strides = [1, 1]} : vector<2x256xf32> to vector<2x192xf32>
    %42 = arith.negf %41 : vector<2x192xf32>
    %43 = math.exp %42 : vector<2x192xf32>
    %cst_19 = arith.constant 1.000000e+00 : f32
    %44 = vector.broadcast %cst_19 : f32 to vector<2x192xf32>
    %45 = arith.addf %44, %43 : vector<2x192xf32>
    %46 = arith.divf %44, %45 : vector<2x192xf32>
    %47 = vector.extract_strided_slice %46 {offsets = [0, 0], sizes = [2, 64], strides = [1, 1]} : vector<2x192xf32> to vector<2x64xf32>
    %48 = vector.extract_strided_slice %46 {offsets = [0, 64], sizes = [2, 64], strides = [1, 1]} : vector<2x192xf32> to vector<2x64xf32>
    %49 = vector.extract_strided_slice %46 {offsets = [0, 128], sizes = [2, 64], strides = [1, 1]} : vector<2x192xf32> to vector<2x64xf32>
    %50 = vector.extract_strided_slice %40 {offsets = [0, 192], sizes = [2, 64], strides = [1, 1]} : vector<2x256xf32> to vector<2x64xf32>
    %51 = math.tanh %50 : vector<2x64xf32>
    %52 = arith.mulf %48, %29 : vector<2x64xf32>
    %53 = arith.mulf %47, %51 : vector<2x64xf32>
    %54 = arith.addf %52, %53 : vector<2x64xf32>
    %55 = math.tanh %54 : vector<2x64xf32>
    %56 = arith.mulf %49, %55 : vector<2x64xf32>
    %c2_i32_20 = arith.constant 2 : i32
    %57 = arith.muli %c1_i32, %c2_i32_20 : i32
    %58 = arith.index_cast %57 : i32 to index
    %c0_21 = arith.constant 0 : index
    %59 = vector.load %arg4[%58, %c0_21] : memref<16x64xf32, #tpu.memory_space<vmem>>, vector<2x64xf32>
    tpu.vector_store %arg4[%58, %c0_21], %56 {strides = array<i32>} : memref<16x64xf32, #tpu.memory_space<vmem>>, vector<2x64xf32>,
    %c2_i32_22 = arith.constant 2 : i32
    %60 = arith.truncf %56 : vector<2x64xf32> to vector<2x64xbf16>
    %cst_23 = arith.constant dense<0.000000e+00> : vector<2x256xf32>
    %61 = tpu.matmul %60, %7, %cst_23 {dimension_numbers = #tpu.dot_dimension_numbers<[1], [0], [0], [1], [0, 0, 1, 1], [], []>} : vector<2x64xbf16>, vector<64x256xbf16>, vector<2x256xf32> -> vector<2x256xf32>
    %c2_i32_24 = arith.constant 2 : i32
    %62 = arith.muli %c2_i32_22, %c2_i32_24 : i32
    %63 = arith.index_cast %62 : i32 to index
    %c0_25 = arith.constant 0 : index
    %64 = vector.load %arg5[%63, %c0_25] : memref<16x256xf32, #tpu.memory_space<vmem>>, vector<2x256xf32>
    %65 = arith.addf %61, %64 : vector<2x256xf32>
    %66 = vector.extract_strided_slice %65 {offsets = [0, 0], sizes = [2, 192], strides = [1, 1]} : vector<2x256xf32> to vector<2x192xf32>
    %67 = arith.negf %66 : vector<2x192xf32>
    %68 = math.exp %67 : vector<2x192xf32>
    %cst_26 = arith.constant 1.000000e+00 : f32
    %69 = vector.broadcast %cst_26 : f32 to vector<2x192xf32>
    %70 = arith.addf %69, %68 : vector<2x192xf32>
    %71 = arith.divf %69, %70 : vector<2x192xf32>
    %72 = vector.extract_strided_slice %71 {offsets = [0, 0], sizes = [2, 64], strides = [1, 1]} : vector<2x192xf32> to vector<2x64xf32>
    %73 = vector.extract_strided_slice %71 {offsets = [0, 64], sizes = [2, 64], strides = [1, 1]} : vector<2x192xf32> to vector<2x64xf32>
    %74 = vector.extract_strided_slice %71 {offsets = [0, 128], sizes = [2, 64], strides = [1, 1]} : vector<2x192xf32> to vector<2x64xf32>
    %75 = vector.extract_strided_slice %65 {offsets = [0, 192], sizes = [2, 64], strides = [1, 1]} : vector<2x256xf32> to vector<2x64xf32>
    %76 = math.tanh %75 : vector<2x64xf32>
    %77 = arith.mulf %73, %54 : vector<2x64xf32>
    %78 = arith.mulf %72, %76 : vector<2x64xf32>
    %79 = arith.addf %77, %78 : vector<2x64xf32>
    %80 = math.tanh %79 : vector<2x64xf32>
    %81 = arith.mulf %74, %80 : vector<2x64xf32>
    %c2_i32_27 = arith.constant 2 : i32
    %82 = arith.muli %c2_i32_22, %c2_i32_27 : i32
    %83 = arith.index_cast %82 : i32 to index
    %c0_28 = arith.constant 0 : index
    %84 = vector.load %arg4[%83, %c0_28] : memref<16x64xf32, #tpu.memory_space<vmem>>, vector<2x64xf32>
    tpu.vector_store %arg4[%83, %c0_28], %81 {strides = array<i32>} : memref<16x64xf32, #tpu.memory_space<vmem>>, vector<2x64xf32>,
    %c3_i32 = arith.constant 3 : i32
    %85 = arith.truncf %81 : vector<2x64xf32> to vector<2x64xbf16>
    %cst_29 = arith.constant dense<0.000000e+00> : vector<2x256xf32>
    %86 = tpu.matmul %85, %7, %cst_29 {dimension_numbers = #tpu.dot_dimension_numbers<[1], [0], [0], [1], [0, 0, 1, 1], [], []>} : vector<2x64xbf16>, vector<64x256xbf16>, vector<2x256xf32> -> vector<2x256xf32>
    %c2_i32_30 = arith.constant 2 : i32
    %87 = arith.muli %c3_i32, %c2_i32_30 : i32
    %88 = arith.index_cast %87 : i32 to index
    %c0_31 = arith.constant 0 : index
    %89 = vector.load %arg5[%88, %c0_31] : memref<16x256xf32, #tpu.memory_space<vmem>>, vector<2x256xf32>
    %90 = arith.addf %86, %89 : vector<2x256xf32>
    %91 = vector.extract_strided_slice %90 {offsets = [0, 0], sizes = [2, 192], strides = [1, 1]} : vector<2x256xf32> to vector<2x192xf32>
    %92 = arith.negf %91 : vector<2x192xf32>
    %93 = math.exp %92 : vector<2x192xf32>
    %cst_32 = arith.constant 1.000000e+00 : f32
    %94 = vector.broadcast %cst_32 : f32 to vector<2x192xf32>
    %95 = arith.addf %94, %93 : vector<2x192xf32>
    %96 = arith.divf %94, %95 : vector<2x192xf32>
    %97 = vector.extract_strided_slice %96 {offsets = [0, 0], sizes = [2, 64], strides = [1, 1]} : vector<2x192xf32> to vector<2x64xf32>
    %98 = vector.extract_strided_slice %96 {offsets = [0, 64], sizes = [2, 64], strides = [1, 1]} : vector<2x192xf32> to vector<2x64xf32>
    %99 = vector.extract_strided_slice %96 {offsets = [0, 128], sizes = [2, 64], strides = [1, 1]} : vector<2x192xf32> to vector<2x64xf32>
    %100 = vector.extract_strided_slice %90 {offsets = [0, 192], sizes = [2, 64], strides = [1, 1]} : vector<2x256xf32> to vector<2x64xf32>
    %101 = math.tanh %100 : vector<2x64xf32>
    %102 = arith.mulf %98, %79 : vector<2x64xf32>
    %103 = arith.mulf %97, %101 : vector<2x64xf32>
    %104 = arith.addf %102, %103 : vector<2x64xf32>
    %105 = math.tanh %104 : vector<2x64xf32>
    %106 = arith.mulf %99, %105 : vector<2x64xf32>
    %c2_i32_33 = arith.constant 2 : i32
    %107 = arith.muli %c3_i32, %c2_i32_33 : i32
    %108 = arith.index_cast %107 : i32 to index
    %c0_34 = arith.constant 0 : index
    %109 = vector.load %arg4[%108, %c0_34] : memref<16x64xf32, #tpu.memory_space<vmem>>, vector<2x64xf32>
    tpu.vector_store %arg4[%108, %c0_34], %106 {strides = array<i32>} : memref<16x64xf32, #tpu.memory_space<vmem>>, vector<2x64xf32>,
    %c4_i32 = arith.constant 4 : i32
    %110 = arith.truncf %106 : vector<2x64xf32> to vector<2x64xbf16>
    %cst_35 = arith.constant dense<0.000000e+00> : vector<2x256xf32>
    %111 = tpu.matmul %110, %7, %cst_35 {dimension_numbers = #tpu.dot_dimension_numbers<[1], [0], [0], [1], [0, 0, 1, 1], [], []>} : vector<2x64xbf16>, vector<64x256xbf16>, vector<2x256xf32> -> vector<2x256xf32>
    %c2_i32_36 = arith.constant 2 : i32
    %112 = arith.muli %c4_i32, %c2_i32_36 : i32
    %113 = arith.index_cast %112 : i32 to index
    %c0_37 = arith.constant 0 : index
    %114 = vector.load %arg5[%113, %c0_37] : memref<16x256xf32, #tpu.memory_space<vmem>>, vector<2x256xf32>
    %115 = arith.addf %111, %114 : vector<2x256xf32>
    %116 = vector.extract_strided_slice %115 {offsets = [0, 0], sizes = [2, 192], strides = [1, 1]} : vector<2x256xf32> to vector<2x192xf32>
    %117 = arith.negf %116 : vector<2x192xf32>
    %118 = math.exp %117 : vector<2x192xf32>
    %cst_38 = arith.constant 1.000000e+00 : f32
    %119 = vector.broadcast %cst_38 : f32 to vector<2x192xf32>
    %120 = arith.addf %119, %118 : vector<2x192xf32>
    %121 = arith.divf %119, %120 : vector<2x192xf32>
    %122 = vector.extract_strided_slice %121 {offsets = [0, 0], sizes = [2, 64], strides = [1, 1]} : vector<2x192xf32> to vector<2x64xf32>
    %123 = vector.extract_strided_slice %121 {offsets = [0, 64], sizes = [2, 64], strides = [1, 1]} : vector<2x192xf32> to vector<2x64xf32>
    %124 = vector.extract_strided_slice %121 {offsets = [0, 128], sizes = [2, 64], strides = [1, 1]} : vector<2x192xf32> to vector<2x64xf32>
    %125 = vector.extract_strided_slice %115 {offsets = [0, 192], sizes = [2, 64], strides = [1, 1]} : vector<2x256xf32> to vector<2x64xf32>
    %126 = math.tanh %125 : vector<2x64xf32>
    %127 = arith.mulf %123, %104 : vector<2x64xf32>
    %128 = arith.mulf %122, %126 : vector<2x64xf32>
    %129 = arith.addf %127, %128 : vector<2x64xf32>
    %130 = math.tanh %129 : vector<2x64xf32>
    %131 = arith.mulf %124, %130 : vector<2x64xf32>
    %c2_i32_39 = arith.constant 2 : i32
    %132 = arith.muli %c4_i32, %c2_i32_39 : i32
    %133 = arith.index_cast %132 : i32 to index
    %c0_40 = arith.constant 0 : index
    %134 = vector.load %arg4[%133, %c0_40] : memref<16x64xf32, #tpu.memory_space<vmem>>, vector<2x64xf32>
    tpu.vector_store %arg4[%133, %c0_40], %131 {strides = array<i32>} : memref<16x64xf32, #tpu.memory_space<vmem>>, vector<2x64xf32>,
    %c5_i32 = arith.constant 5 : i32
    %135 = arith.truncf %131 : vector<2x64xf32> to vector<2x64xbf16>
    %cst_41 = arith.constant dense<0.000000e+00> : vector<2x256xf32>
    %136 = tpu.matmul %135, %7, %cst_41 {dimension_numbers = #tpu.dot_dimension_numbers<[1], [0], [0], [1], [0, 0, 1, 1], [], []>} : vector<2x64xbf16>, vector<64x256xbf16>, vector<2x256xf32> -> vector<2x256xf32>
    %c2_i32_42 = arith.constant 2 : i32
    %137 = arith.muli %c5_i32, %c2_i32_42 : i32
    %138 = arith.index_cast %137 : i32 to index
    %c0_43 = arith.constant 0 : index
    %139 = vector.load %arg5[%138, %c0_43] : memref<16x256xf32, #tpu.memory_space<vmem>>, vector<2x256xf32>
    %140 = arith.addf %136, %139 : vector<2x256xf32>
    %141 = vector.extract_strided_slice %140 {offsets = [0, 0], sizes = [2, 192], strides = [1, 1]} : vector<2x256xf32> to vector<2x192xf32>
    %142 = arith.negf %141 : vector<2x192xf32>
    %143 = math.exp %142 : vector<2x192xf32>
    %cst_44 = arith.constant 1.000000e+00 : f32
    %144 = vector.broadcast %cst_44 : f32 to vector<2x192xf32>
    %145 = arith.addf %144, %143 : vector<2x192xf32>
    %146 = arith.divf %144, %145 : vector<2x192xf32>
    %147 = vector.extract_strided_slice %146 {offsets = [0, 0], sizes = [2, 64], strides = [1, 1]} : vector<2x192xf32> to vector<2x64xf32>
    %148 = vector.extract_strided_slice %146 {offsets = [0, 64], sizes = [2, 64], strides = [1, 1]} : vector<2x192xf32> to vector<2x64xf32>
    %149 = vector.extract_strided_slice %146 {offsets = [0, 128], sizes = [2, 64], strides = [1, 1]} : vector<2x192xf32> to vector<2x64xf32>
    %150 = vector.extract_strided_slice %140 {offsets = [0, 192], sizes = [2, 64], strides = [1, 1]} : vector<2x256xf32> to vector<2x64xf32>
    %151 = math.tanh %150 : vector<2x64xf32>
    %152 = arith.mulf %148, %129 : vector<2x64xf32>
    %153 = arith.mulf %147, %151 : vector<2x64xf32>
    %154 = arith.addf %152, %153 : vector<2x64xf32>
    %155 = math.tanh %154 : vector<2x64xf32>
    %156 = arith.mulf %149, %155 : vector<2x64xf32>
    %c2_i32_45 = arith.constant 2 : i32
    %157 = arith.muli %c5_i32, %c2_i32_45 : i32
    %158 = arith.index_cast %157 : i32 to index
    %c0_46 = arith.constant 0 : index
    %159 = vector.load %arg4[%158, %c0_46] : memref<16x64xf32, #tpu.memory_space<vmem>>, vector<2x64xf32>
    tpu.vector_store %arg4[%158, %c0_46], %156 {strides = array<i32>} : memref<16x64xf32, #tpu.memory_space<vmem>>, vector<2x64xf32>,
    %c6_i32 = arith.constant 6 : i32
    %160 = arith.truncf %156 : vector<2x64xf32> to vector<2x64xbf16>
    %cst_47 = arith.constant dense<0.000000e+00> : vector<2x256xf32>
    %161 = tpu.matmul %160, %7, %cst_47 {dimension_numbers = #tpu.dot_dimension_numbers<[1], [0], [0], [1], [0, 0, 1, 1], [], []>} : vector<2x64xbf16>, vector<64x256xbf16>, vector<2x256xf32> -> vector<2x256xf32>
    %c2_i32_48 = arith.constant 2 : i32
    %162 = arith.muli %c6_i32, %c2_i32_48 : i32
    %163 = arith.index_cast %162 : i32 to index
    %c0_49 = arith.constant 0 : index
    %164 = vector.load %arg5[%163, %c0_49] : memref<16x256xf32, #tpu.memory_space<vmem>>, vector<2x256xf32>
    %165 = arith.addf %161, %164 : vector<2x256xf32>
    %166 = vector.extract_strided_slice %165 {offsets = [0, 0], sizes = [2, 192], strides = [1, 1]} : vector<2x256xf32> to vector<2x192xf32>
    %167 = arith.negf %166 : vector<2x192xf32>
    %168 = math.exp %167 : vector<2x192xf32>
    %cst_50 = arith.constant 1.000000e+00 : f32
    %169 = vector.broadcast %cst_50 : f32 to vector<2x192xf32>
    %170 = arith.addf %169, %168 : vector<2x192xf32>
    %171 = arith.divf %169, %170 : vector<2x192xf32>
    %172 = vector.extract_strided_slice %171 {offsets = [0, 0], sizes = [2, 64], strides = [1, 1]} : vector<2x192xf32> to vector<2x64xf32>
    %173 = vector.extract_strided_slice %171 {offsets = [0, 64], sizes = [2, 64], strides = [1, 1]} : vector<2x192xf32> to vector<2x64xf32>
    %174 = vector.extract_strided_slice %171 {offsets = [0, 128], sizes = [2, 64], strides = [1, 1]} : vector<2x192xf32> to vector<2x64xf32>
    %175 = vector.extract_strided_slice %165 {offsets = [0, 192], sizes = [2, 64], strides = [1, 1]} : vector<2x256xf32> to vector<2x64xf32>
    %176 = math.tanh %175 : vector<2x64xf32>
    %177 = arith.mulf %173, %154 : vector<2x64xf32>
    %178 = arith.mulf %172, %176 : vector<2x64xf32>
    %179 = arith.addf %177, %178 : vector<2x64xf32>
    %180 = math.tanh %179 : vector<2x64xf32>
    %181 = arith.mulf %174, %180 : vector<2x64xf32>
    %c2_i32_51 = arith.constant 2 : i32
    %182 = arith.muli %c6_i32, %c2_i32_51 : i32
    %183 = arith.index_cast %182 : i32 to index
    %c0_52 = arith.constant 0 : index
    %184 = vector.load %arg4[%183, %c0_52] : memref<16x64xf32, #tpu.memory_space<vmem>>, vector<2x64xf32>
    tpu.vector_store %arg4[%183, %c0_52], %181 {strides = array<i32>} : memref<16x64xf32, #tpu.memory_space<vmem>>, vector<2x64xf32>,
    %c7_i32 = arith.constant 7 : i32
    %185 = arith.truncf %181 : vector<2x64xf32> to vector<2x64xbf16>
    %cst_53 = arith.constant dense<0.000000e+00> : vector<2x256xf32>
    %186 = tpu.matmul %185, %7, %cst_53 {dimension_numbers = #tpu.dot_dimension_numbers<[1], [0], [0], [1], [0, 0, 1, 1], [], []>} : vector<2x64xbf16>, vector<64x256xbf16>, vector<2x256xf32> -> vector<2x256xf32>
    %c2_i32_54 = arith.constant 2 : i32
    %187 = arith.muli %c7_i32, %c2_i32_54 : i32
    %188 = arith.index_cast %187 : i32 to index
    %c0_55 = arith.constant 0 : index
    %189 = vector.load %arg5[%188, %c0_55] : memref<16x256xf32, #tpu.memory_space<vmem>>, vector<2x256xf32>
    %190 = arith.addf %186, %189 : vector<2x256xf32>
    %191 = vector.extract_strided_slice %190 {offsets = [0, 0], sizes = [2, 192], strides = [1, 1]} : vector<2x256xf32> to vector<2x192xf32>
    %192 = arith.negf %191 : vector<2x192xf32>
    %193 = math.exp %192 : vector<2x192xf32>
    %cst_56 = arith.constant 1.000000e+00 : f32
    %194 = vector.broadcast %cst_56 : f32 to vector<2x192xf32>
    %195 = arith.addf %194, %193 : vector<2x192xf32>
    %196 = arith.divf %194, %195 : vector<2x192xf32>
    %197 = vector.extract_strided_slice %196 {offsets = [0, 0], sizes = [2, 64], strides = [1, 1]} : vector<2x192xf32> to vector<2x64xf32>
    %198 = vector.extract_strided_slice %196 {offsets = [0, 64], sizes = [2, 64], strides = [1, 1]} : vector<2x192xf32> to vector<2x64xf32>
    %199 = vector.extract_strided_slice %196 {offsets = [0, 128], sizes = [2, 64], strides = [1, 1]} : vector<2x192xf32> to vector<2x64xf32>
    %200 = vector.extract_strided_slice %190 {offsets = [0, 192], sizes = [2, 64], strides = [1, 1]} : vector<2x256xf32> to vector<2x64xf32>
    %201 = math.tanh %200 : vector<2x64xf32>
    %202 = arith.mulf %198, %179 : vector<2x64xf32>
    %203 = arith.mulf %197, %201 : vector<2x64xf32>
    %204 = arith.addf %202, %203 : vector<2x64xf32>
    %205 = math.tanh %204 : vector<2x64xf32>
    %206 = arith.mulf %199, %205 : vector<2x64xf32>
    %c2_i32_57 = arith.constant 2 : i32
    %207 = arith.muli %c7_i32, %c2_i32_57 : i32
    %208 = arith.index_cast %207 : i32 to index
    %c0_58 = arith.constant 0 : index
    %209 = vector.load %arg4[%208, %c0_58] : memref<16x64xf32, #tpu.memory_space<vmem>>, vector<2x64xf32>
    tpu.vector_store %arg4[%208, %c0_58], %206 {strides = array<i32>} : memref<16x64xf32, #tpu.memory_space<vmem>>, vector<2x64xf32>,
    %c8_i32 = arith.constant 8 : i32
    return
  }
}

</mosaic_0001>

<bundles_post_ra>
// kernel: lstm_rnn_forward.1
= control target key start
LH: loop header
LB: loop body
LE: loop exit
PB: predicated region body
PF: predicated region fallthrough
CT: control target
= control target key end

     0   :  { %v1214_v55 = vmov 0   ;;  %vm296_vm8 = vcmask 517120   ;;  %vm210_vm9 = vcmask 523264   ;;  %s1565_s1 = inlined_call_operand.vmem [shape: bf16[128,256], index: 1, kind: input, shape index: {}]   ;;  %s1566_s2 = inlined_call_operand.vmem [shape: bf16[64,256], index: 2, kind: input, shape index: {}]   ;;  %s1567_s0 = inlined_call_operand.vmem [shape: bf16[16,128], index: 0, kind: input, shape index: {}]   ;;  %s1568_s3 = inlined_call_operand.vmem [shape: f32[1,256], index: 3, kind: input, shape index: {}]   ;;  %s1569_s4 = inlined_call_operand.vmem [shape: f32[16,64], index: 4, kind: output, shape index: {}]  }
   0x1   :  { %v1106_v0 = vld [vmem:[%s1565_s1 + $0x74] sm:$0xf]  ;;  %v1025_v1 = vld [vmem:[%s1565_s1 + $0x78] sm:$0xf0]  ;;  %v1104_v2 = vld [vmem:[%s1565_s1 + $0x64] sm:$0xf] }
   0x2   :  { %v1028_v3 = vor.u32 %v1106_v0, %v1025_v1  ;;  %v1017_v4 = vld [vmem:[%s1565_s1 + $0x68] sm:$0xf0]  ;;  %v1114_v5 = vld [vmem:[%s1566_s2 + $0x34] sm:$0xf]  ;;  %v1057_v8 = vld [vmem:[%s1566_s2 + $0x38] sm:$0xf0] }
   0x3   :  { %v1020_v6 = vor.u32 %v1104_v2, %v1017_v4  ;;  %v1102_v7 = vld [vmem:[%s1565_s1 + $0x54] sm:$0xf]  ;;  %v1009_v9 = vld [vmem:[%s1565_s1 + $0x58] sm:$0xf0]  ;;  %v1265_v10 = vor.u32 %v1114_v5, %v1057_v8  ;;  %v1112_v11 = vld [vmem:[%s1566_s2 + $0x24] sm:$0xf] }
   0x4   :  { %142 = vmatpush.bf16.msra.mxu1 %v1028_v3  ;;  %v1049_v12 = vld [vmem:[%s1566_s2 + $0x28] sm:$0xf0]  ;;  %v1012_v14 = vor.u32 %v1102_v7, %v1009_v9  ;;  %v1100_v15 = vld [vmem:[%s1565_s1 + $0x44] sm:$0xf]  ;;  %v1110_v16 = vld [vmem:[%s1566_s2 + $0x14] sm:$0xf] }
   0x5   :  { %231 = vmatpush.bf16.msra.mxu3 %v1265_v10  ;;  %v1274_v13 = vor.u32 %v1112_v11, %v1049_v12  ;;  %v1041_v17 = vld [vmem:[%s1566_s2 + $0x18] sm:$0xf0]  ;;  %v1001_v18 = vld [vmem:[%s1565_s1 + $0x48] sm:$0xf0]  ;;  %v1023_v19 = vld [vmem:[%s1565_s1 + $0x70] sm:$0xf] }
   0x6   :  { %v1107_v20 = vld [vmem:[%s1565_s1 + $0x74] sm:$0xf0]  ;;  %v1015_v22 = vld [vmem:[%s1565_s1 + $0x60] sm:$0xf]  ;;  %v1105_v23 = vld [vmem:[%s1565_s1 + $0x64] sm:$0xf0]  ;;  %v1307_v26 = vor.u32 %v1110_v16, %v1041_v17  ;;  %v1004_v27 = vor.u32 %v1100_v15, %v1001_v18 }
   0x7   :  { %v1024_v21 = vor.u32 %v1107_v20, %v1023_v19  ;;  %v1098_v24 = vld [vmem:[%s1565_s1 + $0x34] sm:$0xf]  ;;  %v993_v25 = vld [vmem:[%s1565_s1 + $0x38] sm:$0xf0]  ;;  %v1108_v28 = vld [vmem:[%s1566_s2 + $0x4] sm:$0xf]  ;;  %v1016_v30 = vor.u32 %v1105_v23, %v1015_v22 }
   0x8   :  { %143 = vmatpush.bf16.msra.mxu1 %v1020_v6  ;;  %v1033_v29 = vld [vmem:[%s1566_s2 + $0x8] sm:$0xf0]  ;;  %v1007_v31 = vld [vmem:[%s1565_s1 + $0x50] sm:$0xf]  ;;  %v1103_v32 = vld [vmem:[%s1565_s1 + $0x54] sm:$0xf0]  ;;  %v996_v39 = vor.u32 %v1098_v24, %v993_v25 }
   0x9   :  { %232 = vmatpush.bf16.msra.mxu3 %v1274_v13  ;;  %128 = vmatpush.bf16.msra.mxu0 %v1024_v21  ;;  %v1055_v33 = vld [vmem:[%s1566_s2 + $0x30] sm:$0xf]  ;;  %v1115_v34 = vld [vmem:[%s1566_s2 + $0x34] sm:$0xf0]  ;;  %v1047_v36 = vld [vmem:[%s1566_s2 + $0x20] sm:$0xf]  ;;  %v1333_v37 = vor.u32 %v1108_v28, %v1033_v29  ;;  %v1008_v41 = vor.u32 %v1103_v32, %v1007_v31 }
   0xa   :  { %v1327_v35 = vor.u32 %v1115_v34, %v1055_v33  ;;  %v1113_v38 = vld [vmem:[%s1566_s2 + $0x24] sm:$0xf0]  ;;  %v1096_v40 = vld [vmem:[%s1565_s1 + $0x24] sm:$0xf]  ;;  %v985_v42 = vld [vmem:[%s1565_s1 + $0x28] sm:$0xf0] }
   0xb   :  { %v999_v43 = vld [vmem:[%s1565_s1 + $0x40] sm:$0xf]  ;;  %v1101_v44 = vld [vmem:[%s1565_s1 + $0x44] sm:$0xf0]  ;;  %v1351_v45 = vor.u32 %v1113_v38, %v1047_v36  ;;  %v1039_v46 = vld [vmem:[%s1566_s2 + $0x10] sm:$0xf]  ;;  %v988_v48 = vor.u32 %v1096_v40, %v985_v42 }
   0xc   :  { %144 = vmatpush.bf16.msra.mxu1 %v1012_v14  ;;  %218 = vmatpush.bf16.msra.mxu2 %v1327_v35  ;;  %v1111_v47 = vld [vmem:[%s1566_s2 + $0x14] sm:$0xf0]  ;;  %v1094_v49 = vld [vmem:[%s1565_s1 + $0x14] sm:$0xf]  ;;  %v1000_v50 = vor.u32 %v1101_v44, %v999_v43  ;;  %v977_v51 = vld [vmem:[%s1565_s1 + $0x18] sm:$0xf0] }
   0xd   :  { %233 = vmatpush.bf16.msra.mxu3 %v1307_v26  ;;  %129 = vmatpush.bf16.msra.mxu0 %v1016_v30  ;;  %v991_v52 = vld [vmem:[%s1565_s1 + $0x30] sm:$0xf]  ;;  %v1099_v53 = vld [vmem:[%s1565_s1 + $0x34] sm:$0xf0]  ;;  %v1373_v54 = vor.u32 %v1111_v47, %v1039_v46  ;;  %v1031_v56 = vld [vmem:[%s1566_s2] sm:$0xf]  ;;  %v980_v58 = vor.u32 %v1094_v49, %v977_v51 }
   0xe   :  { %v1109_v57 = vld [vmem:[%s1566_s2 + $0x4] sm:$0xf0]  ;;  %v1092_v59 = vld [vmem:[%s1565_s1 + $0x4] sm:$0xf]  ;;  %v992_v60 = vor.u32 %v1099_v53, %v991_v52  ;;  %v969_v61 = vld [vmem:[%s1565_s1 + $0x8] sm:$0xf0] }
   0xf   :  { %v983_v62 = vld [vmem:[%s1565_s1 + $0x20] sm:$0xf]  ;;  %v1097_v63 = vld [vmem:[%s1565_s1 + $0x24] sm:$0xf0]  ;;  %v1395_v0 = vor.u32 %v1109_v57, %v1031_v56  ;;  %v972_v1 = vor.u32 %v1092_v59, %v969_v61  ;;  %v975_v3 = vld [vmem:[%s1565_s1 + $0x10] sm:$0xf] }
  0x10   :  { %145 = vmatpush.bf16.msra.mxu1 %v1004_v27  ;;  %219 = vmatpush.bf16.msra.mxu2 %v1351_v45  ;;  %v984_v2 = vor.u32 %v1097_v63, %v983_v62  ;;  %v1095_v4 = vld [vmem:[%s1565_s1 + $0x14] sm:$0xf0]  ;;  %v1091_v5 = vld [vmem:[%s1567_s0] sm:$0xff]  ;;  %v1093_v8 = vld [vmem:[%s1565_s1 + $0x4] sm:$0xf0] }
  0x11   :  { %234 = vmatpush.bf16.msra.mxu3 %v1333_v37  ;;  %130 = vmatpush.bf16.msra.mxu0 %v1008_v41  ;;  %v976_v6 = vor.u32 %v1095_v4, %v975_v3  ;;  %v967_v7 = vld [vmem:[%s1565_s1] sm:$0xf] }
  0x12   :  { %v968_v9 = vor.u32 %v1093_v8, %v967_v7  ;;  %v36_v12 = vld [vmem:[%s1568_s3] sm:$0x3]  ;;  %s1215_s3 = smov 64  }
  0x13   :  { %v39_v14 = vperm.slane %v36_v12, 1  ;;  %v38_v19 = vperm.slane %v36_v12, 0 }
  0x14   :  { %146 = vmatpush.bf16.msra.mxu1 %v996_v39  ;;  %235 = vmatmul.bf16.vlgmr.msra.gmra.mxu3 %v1214_v55 }
  0x15   :  { %327 = vmatpush.bf16.msrb.mxu3 %v1265_v10  ;;  %131 = vmatpush.bf16.msra.mxu0 %v1000_v50 }
  0x16   :  { %220 = vmatpush.bf16.msra.mxu2 %v1373_v54 }
  0x18   :  { %147 = vmatpush.bf16.msra.mxu1 %v988_v48 }
  0x19   :  { %328 = vmatpush.bf16.msrb.mxu3 %v1274_v13  ;;  %132 = vmatpush.bf16.msra.mxu0 %v992_v60 }
  0x1a   :  { %221 = vmatpush.bf16.msra.mxu2 %v1395_v0 }
  0x1c   :  { %148 = vmatpush.bf16.msra.mxu1 %v980_v58 }
  0x1d   :  { %329 = vmatpush.bf16.msrb.mxu3 %v1307_v26  ;;  %133 = vmatpush.bf16.msra.mxu0 %v984_v2 }
  0x1e   :  { %314 = vmatpush.bf16.msrb.mxu2 %v1327_v35 }
  0x1f   :  { %222 = vmatmul.bf16.vlgmr.msra.gmra.mxu2 %v1214_v55 }
  0x20   :  { %149 = vmatpush.bf16.msra.mxu1 %v972_v1 }
  0x21   :  { %330 = vmatpush.bf16.msrb.mxu3 %v1333_v37  ;;  %134 = vmatpush.bf16.msra.mxu0 %v976_v6 }
  0x22   :  { %315 = vmatpush.bf16.msrb.mxu2 %v1351_v45 }
  0x23   :  { %150 = vmatmul.bf16.vlgmr.msra.gmra.mxu1 %v1091_v5 }
  0x24   :  { %422 = vmatpush.bf16.msrb.mxu1 %v1265_v10 }
  0x25   :  { %517 = vmatpush.bf16.msra.mxu3 %v1265_v10  ;;  %135 = vmatpush.bf16.msra.mxu0 %v968_v9 }
  0x26   :  { %316 = vmatpush.bf16.msrb.mxu2 %v1373_v54 }
  0x28   :  { %423 = vmatpush.bf16.msrb.mxu1 %v1274_v13  ;;  %136 = vmatmul.bf16.vlgmr.msra.gmra.mxu0 %v1091_v5 }
  0x29   :  { %518 = vmatpush.bf16.msra.mxu3 %v1274_v13  ;;  %409 = vmatpush.bf16.msrb.mxu0 %v1327_v35 }
  0x2a   :  { %317 = vmatpush.bf16.msrb.mxu2 %v1395_v0 }
  0x2c   :  { %424 = vmatpush.bf16.msrb.mxu1 %v1307_v26 }
  0x2d   :  { %519 = vmatpush.bf16.msra.mxu3 %v1307_v26  ;;  %410 = vmatpush.bf16.msrb.mxu0 %v1351_v45 }
  0x2e   :  { %504 = vmatpush.bf16.msra.mxu2 %v1327_v35 }
  0x30   :  { %425 = vmatpush.bf16.msrb.mxu1 %v1333_v37 }
  0x31   :  { %520 = vmatpush.bf16.msra.mxu3 %v1333_v37  ;;  %411 = vmatpush.bf16.msrb.mxu0 %v1373_v54 }
  0x32   :  { %505 = vmatpush.bf16.msra.mxu2 %v1351_v45 }
  0x34   :  { %606 = vmatpush.bf16.msra.mxu1 %v1265_v10 }
  0x35   :  { %412 = vmatpush.bf16.msrb.mxu0 %v1395_v0 }
  0x36   :  { %506 = vmatpush.bf16.msra.mxu2 %v1373_v54 }
  0x38   :  { %607 = vmatpush.bf16.msra.mxu1 %v1274_v13 }
  0x39   :  { %593 = vmatpush.bf16.msra.mxu0 %v1327_v35 }
  0x3a   :  { %507 = vmatpush.bf16.msra.mxu2 %v1395_v0 }
  0x3c   :  { %608 = vmatpush.bf16.msra.mxu1 %v1307_v26 }
  0x3d   :  { %594 = vmatpush.bf16.msra.mxu0 %v1351_v45 }
  0x40   :  { %609 = vmatpush.bf16.msra.mxu1 %v1333_v37 }
  0x41   :  { %595 = vmatpush.bf16.msra.mxu0 %v1373_v54 }
  0x45   :  { %596 = vmatpush.bf16.msra.mxu0 %v1395_v0 }
  0x97   :  { %v236_v11 = vpop.f32.mrf.mxu3 }
  0x9f   :  { %v238_v17 = vpop.f32.mrf.mxu3 }
  0xa0   :  { %v151_v15 = vpop.f32.mrf.mxu1 }
  0xa1   :  { %v152_v16 = vadd.f32 %v151_v15, %v39_v14 }
  0xa2   :  { %v223_v18 = vpop.f32.mrf.mxu2 }
  0xa3   :  { %157 = vst [vmem:[#allocation2] sm:$0xff] %v152_v16 }
  0xa5   :  { %v137_v21 = vpop.f32.mrf.mxu0 }
  0xa6   :  { %v138_v23 = vadd.f32 %v137_v21, %v38_v19 }
  0xa8   :  { %v153_v20 = vpop.f32.mrf.mxu1  ;;  %156 = vst [vmem:[#allocation2 + $0x10] sm:$0xff] %v138_v23 }
  0xa9   :  { %v154_v22 = vadd.f32 %v153_v20, %v39_v14 }
  0xaa   :  { %v169_v24 = vld [vmem:[#allocation2] sm:$0x3]  ;;  %v225_v27 = vpop.f32.mrf.mxu2  ;;  %v300_v9 = vld [vmem:[#allocation2] sm:$0xc] }
  0xab   :  { %v237_v25 = vadd.f32 %v236_v11, %v169_v24  ;;  %159 = vst [vmem:[#allocation2 + $0x8] sm:$0xff] %v154_v22  ;;  %v304_v11 = vrot.slane %v300_v9, 2 }
  0xad   :  { %1118 = vtanh.f32 %v237_v25  ;;  %v139_v28 = vpop.f32.mrf.mxu0  ;;  %v1062_v56 = vmul.f32 -1.442695, %v237_v25 }
  0xae   :  { %v140_v29 = vadd.f32 %v139_v28, %v38_v19 }
  0xaf   :  { %v168_v31 = vld [vmem:[#allocation2 + $0x10] sm:$0x3]  ;;  %v299_v19 = vld [vmem:[#allocation2 + $0x10] sm:$0xc] }
  0xb0   :  { %158 = vst [vmem:[#allocation2 + $0x18] sm:$0xff] %v140_v29  ;;  %v224_v32 = vadd.f32 %v223_v18, %v168_v31  ;;  %v303_v20 = vrot.slane %v299_v19, 2 }
  0xb2   :  { %v1061_v33 = vmul.f32 -1.442695, %v224_v32 }
  0xb3   :  { %v1119_v30 = vpop.eup %1118 }
  0xb4   :  { %281 = vrot.lane.b32.xlu0 %v1119_v30, %s1215_s3  ;;  %1120 = vpow2.f32 %v1061_v33 }
  0xba   :  { %v1121_v34 = vpop.eup %1120 }
  0xbb   :  { %v246_v36 = vadd.f32 1.0, %v1121_v34 }
  0xbd   :  { %1122 = vrcp.f32 %v246_v36  ;;  %vm253_vm0 = vweird.f32 %v246_v36  ;;  %v259_v42 = vand.u32 2147483648, %v246_v36  ;;  %v257_v44 = vand.u32 2147483647, %v246_v36 }
  0xbf   :  { %v260_v46 = vor.u32 1.1754944e-38, %v259_v42  ;;  %vm258_vm3 = vcmp.eq.f32.partialorder %v257_v44, 8.507059e+37 }
  0xc3   :  { %v1123_v38 = vpop.eup %1122 }
  0xc4   :  { %v249_v39 = vmul.f32 %v1123_v38, %v246_v36  ;;  %vm254_vm1 = vweird.f32 %v1123_v38 }
  0xc5   :  { %vm255_vm2 = vmor %vm253_vm0, %vm254_vm1 }
  0xc6   :  { %v250_v40 = vsub.f32 1.0, %v249_v39 }
  0xc8   :  { %v251_v41 = vmul.f32 %v1123_v38, %v250_v40 }
  0xca   :  { %v252_v43 = vadd.f32 %v1123_v38, %v251_v41 }
  0xcc   :  { %v256_v47 = vsel %vm255_vm2, %v1123_v38, %v252_v43 }
  0xcd   :  { %v261_v49 = vsel %vm258_vm3, %v260_v46, %v256_v47 }
  0xce   :  { %v279_v51 = vmul.f32 0.0, %v261_v49 }
 0x126   :  { %v282_v48 = vpop.permute.xlu0 %281 }
 0x127   :  { %v284_v50 = vmul.f32 %v282_v48, %v261_v49 }
 0x129   :  { %286 = vrot.lane.b32.xlu0 %v284_v50, %s1215_s3 }
 0x19b   :  { %v287_v52 = vpop.permute.xlu0 %286 }
 0x19c   :  { %v1449_v53 = vadd.f32 %v287_v52, %v279_v51 }
 0x19e   :  { %1124 = vtanh.f32 %v1449_v53 }
 0x19f   :  { %1126 = vpow2.f32 %v1062_v56 }
 0x1a4   :  { %v1125_v55 = vpop.eup %1124 }
 0x1a5   :  { %292 = vrot.lane.b32.xlu1 %v1125_v55, %s1215_s3  ;;  %v1127_v57 = vpop.eup %1126 }
 0x1a6   :  { %v247_v58 = vadd.f32 1.0, %v1127_v57 }
 0x1a8   :  { %1128 = vrcp.f32 %v247_v58  ;;  %v274_v1 = vand.u32 2147483648, %v247_v58  ;;  %vm268_vm5 = vweird.f32 %v247_v58  ;;  %v272_v2 = vand.u32 2147483647, %v247_v58 }
 0x1aa   :  { %v275_v4 = vor.u32 1.1754944e-38, %v274_v1  ;;  %vm273_vm7 = vcmp.eq.f32.partialorder %v272_v2, 8.507059e+37 }
 0x1ae   :  { %v1129_v59 = vpop.eup %1128 }
 0x1af   :  { %v264_v60 = vmul.f32 %v1129_v59, %v247_v58  ;;  %vm269_vm4 = vweird.f32 %v1129_v59 }
 0x1b0   :  { %vm270_vm6 = vmor %vm268_vm5, %vm269_vm4 }
 0x1b1   :  { %v265_v61 = vsub.f32 1.0, %v264_v60 }
 0x1b3   :  { %v266_v62 = vmul.f32 %v1129_v59, %v265_v61 }
 0x1b5   :  { %v267_v63 = vadd.f32 %v1129_v59, %v266_v62  ;;  %v395_v62 = vld [vmem:[#allocation2] sm:$0x30] }
 0x1b7   :  { %v271_v3 = vsel %vm270_vm6, %v1129_v59, %v267_v63  ;;  %v399_v63 = vrot.slane %v395_v62, 4 }
 0x1b8   :  { %v276_v5 = vsel %vm273_vm7, %v275_v4, %v271_v3 }
 0x217   :  { %v293_v6 = vpop.permute.xlu1 %292 }
 0x218   :  { %v295_v7 = vmul.f32 %v293_v6, %v276_v5 }
 0x21a   :  { %297 = vst.msk [vmem:[%s1569_s4] sm:$0x3] %vm296_vm8, %v295_v7  ;;  %v298_v8 = vpack.c.bf16 %v295_v7, %v295_v7  ;;  %v394_v7 = vld [vmem:[#allocation2 + $0x10] sm:$0x30] }
 0x21c   :  { %1063 = vmatmul.msk.bf16.vlgmr.msrb.gmra.mxu2 %vm210_vm9, %v298_v8  ;;  %1064 = vmatmul.msk.bf16.vlgmr.msrb.gmra.mxu3 %vm210_vm9, %v298_v8  ;;  %v398_v8 = vrot.slane %v394_v7, 4 }
 0x21d   :  { %701 = vmatpush.bf16.msrb.mxu3 %v1265_v10  ;;  %688 = vmatpush.bf16.msrb.mxu2 %v1327_v35 }
 0x221   :  { %702 = vmatpush.bf16.msrb.mxu3 %v1274_v13  ;;  %689 = vmatpush.bf16.msrb.mxu2 %v1351_v45 }
 0x225   :  { %703 = vmatpush.bf16.msrb.mxu3 %v1307_v26  ;;  %690 = vmatpush.bf16.msrb.mxu2 %v1373_v54 }
 0x229   :  { %704 = vmatpush.bf16.msrb.mxu3 %v1333_v37  ;;  %691 = vmatpush.bf16.msrb.mxu2 %v1395_v0 }
 0x29f   :  { %v319_v12 = vpop.f32.mrf.mxu2  ;;  %v332_v14 = vpop.f32.mrf.mxu3 }
 0x2a0   :  { %v333_v15 = vadd.f32 %v332_v14, %v304_v11  ;;  %v320_v21 = vadd.f32 %v319_v12, %v303_v20 }
 0x2a2   :  { %1130 = vtanh.f32 %v333_v15  ;;  %v1065_v22 = vmul.f32 -1.442695, %v320_v21  ;;  %v1066_v44 = vmul.f32 -1.442695, %v333_v15 }
 0x2a4   :  { %1132 = vpow2.f32 %v1065_v22 }
 0x2a7   :  { %v321_v16 = vpop.f32.mrf.mxu2  ;;  %v334_v17 = vpop.f32.mrf.mxu3 }
 0x2a8   :  { %v1131_v18 = vpop.eup %1130 }
 0x2a9   :  { %377 = vrot.lane.b32.xlu1 %v1131_v18, %s1215_s3 }
 0x2aa   :  { %v1133_v23 = vpop.eup %1132 }
 0x2ab   :  { %v342_v24 = vadd.f32 1.0, %v1133_v23 }
 0x2ad   :  { %1134 = vrcp.f32 %v342_v24  ;;  %v355_v31 = vand.u32 2147483648, %v342_v24  ;;  %vm349_vm11 = vweird.f32 %v342_v24  ;;  %v353_v32 = vand.u32 2147483647, %v342_v24 }
 0x2af   :  { %v356_v34 = vor.u32 1.1754944e-38, %v355_v31  ;;  %vm354_vm13 = vcmp.eq.f32.partialorder %v353_v32, 8.507059e+37 }
 0x2b3   :  { %v1135_v25 = vpop.eup %1134 }
 0x2b4   :  { %v345_v27 = vmul.f32 %v1135_v25, %v342_v24  ;;  %vm350_vm10 = vweird.f32 %v1135_v25 }
 0x2b5   :  { %vm351_vm12 = vmor %vm349_vm11, %vm350_vm10 }
 0x2b6   :  { %v346_v28 = vsub.f32 1.0, %v345_v27 }
 0x2b8   :  { %v347_v29 = vmul.f32 %v1135_v25, %v346_v28 }
 0x2ba   :  { %v348_v30 = vadd.f32 %v1135_v25, %v347_v29 }
 0x2bc   :  { %v352_v33 = vsel %vm351_vm12, %v1135_v25, %v348_v30 }
 0x2bd   :  { %v357_v38 = vsel %vm354_vm13, %v356_v34, %v352_v33 }
 0x2be   :  { %v375_v40 = vmul.f32 %v357_v38, %v1449_v53 }
 0x31b   :  { %v378_v36 = vpop.permute.xlu1 %377 }
 0x31c   :  { %v380_v39 = vmul.f32 %v378_v36, %v357_v38 }
 0x31e   :  { %382 = vrot.lane.b32.xlu2 %v380_v39, %s1215_s3 }
 0x378   :  { %v383_v41 = vpop.permute.xlu2 %382 }
 0x379   :  { %v1470_v42 = vadd.f32 %v383_v41, %v375_v40 }
 0x37b   :  { %1136 = vtanh.f32 %v1470_v42 }
 0x37c   :  { %1138 = vpow2.f32 %v1066_v44 }
 0x381   :  { %v1137_v43 = vpop.eup %1136 }
 0x382   :  { %388 = vrot.lane.b32.xlu2 %v1137_v43, %s1215_s3  ;;  %v1139_v46 = vpop.eup %1138 }
 0x383   :  { %v343_v47 = vadd.f32 1.0, %v1139_v46 }
 0x385   :  { %1140 = vrcp.f32 %v343_v47  ;;  %v370_v53 = vand.u32 2147483648, %v343_v47  ;;  %vm364_vm15 = vweird.f32 %v343_v47  ;;  %v368_v55 = vand.u32 2147483647, %v343_v47 }
 0x387   :  { %v371_v57 = vor.u32 1.1754944e-38, %v370_v53  ;;  %vm369_vm1 = vcmp.eq.f32.partialorder %v368_v55, 8.507059e+37 }
 0x38b   :  { %v1141_v48 = vpop.eup %1140 }
 0x38c   :  { %v360_v49 = vmul.f32 %v1141_v48, %v343_v47  ;;  %vm365_vm14 = vweird.f32 %v1141_v48 }
 0x38d   :  { %vm366_vm0 = vmor %vm364_vm15, %vm365_vm14 }
 0x38e   :  { %v361_v50 = vsub.f32 1.0, %v360_v49 }
 0x390   :  { %v362_v51 = vmul.f32 %v1141_v48, %v361_v50 }
 0x392   :  { %v363_v52 = vadd.f32 %v1141_v48, %v362_v51  ;;  %v490_v51 = vld [vmem:[#allocation2] sm:$0xc0] }
 0x394   :  { %v367_v56 = vsel %vm366_vm0, %v1141_v48, %v363_v52  ;;  %v494_v52 = vrot.slane %v490_v51, 6 }
 0x395   :  { %v372_v58 = vsel %vm369_vm1, %v371_v57, %v367_v56 }
 0x3dc   :  { %v389_v59 = vpop.permute.xlu2 %388 }
 0x3dd   :  { %v391_v60 = vmul.f32 %v389_v59, %v372_v58 }
 0x3df   :  { %392 = vst.msk [vmem:[%s1569_s4 + $0x2] sm:$0x3] %vm296_vm8, %v391_v60  ;;  %v393_v61 = vpack.c.bf16 %v391_v60, %v391_v60 }
 0x3e1   :  { %1067 = vmatmul.msk.bf16.vlgmr.msrb.gmra.mxu0 %vm210_vm9, %v393_v61  ;;  %1068 = vmatmul.msk.bf16.vlgmr.msrb.gmra.mxu1 %vm210_vm9, %v393_v61 }
 0x3e2   :  { %796 = vmatpush.bf16.msrb.mxu1 %v1265_v10  ;;  %783 = vmatpush.bf16.msrb.mxu0 %v1327_v35 }
 0x3e6   :  { %797 = vmatpush.bf16.msrb.mxu1 %v1274_v13  ;;  %784 = vmatpush.bf16.msrb.mxu0 %v1351_v45 }
 0x3ea   :  { %798 = vmatpush.bf16.msrb.mxu1 %v1307_v26  ;;  %785 = vmatpush.bf16.msrb.mxu0 %v1373_v54 }
 0x3ee   :  { %799 = vmatpush.bf16.msrb.mxu1 %v1333_v37  ;;  %786 = vmatpush.bf16.msrb.mxu0 %v1395_v0 }
 0x45e   :  { %v414_v1 = vpop.f32.mrf.mxu0  ;;  %v427_v2 = vpop.f32.mrf.mxu1 }
 0x45f   :  { %v428_v3 = vadd.f32 %v427_v2, %v399_v63  ;;  %v415_v9 = vadd.f32 %v414_v1, %v398_v8 }
 0x461   :  { %1142 = vtanh.f32 %v428_v3  ;;  %v1069_v11 = vmul.f32 -1.442695, %v415_v9  ;;  %v1070_v32 = vmul.f32 -1.442695, %v428_v3 }
 0x463   :  { %1144 = vpow2.f32 %v1069_v11 }
 0x466   :  { %v416_v4 = vpop.f32.mrf.mxu0  ;;  %v429_v5 = vpop.f32.mrf.mxu1 }
 0x467   :  { %v1143_v6 = vpop.eup %1142 }
 0x468   :  { %472 = vrot.lane.b32.xlu0 %v1143_v6, %s1215_s3 }
 0x469   :  { %v1145_v12 = vpop.eup %1144 }
 0x46a   :  { %v437_v14 = vadd.f32 1.0, %v1145_v12 }
 0x46c   :  { %1146 = vrcp.f32 %v437_v14  ;;  %v450_v20 = vand.u32 2147483648, %v437_v14  ;;  %vm444_vm3 = vweird.f32 %v437_v14  ;;  %v448_v21 = vand.u32 2147483647, %v437_v14 }
 0x46e   :  { %v451_v23 = vor.u32 1.1754944e-38, %v450_v20  ;;  %vm449_vm5 = vcmp.eq.f32.partialorder %v448_v21, 8.507059e+37 }
 0x472   :  { %v1147_v15 = vpop.eup %1146 }
 0x473   :  { %v440_v16 = vmul.f32 %v1147_v15, %v437_v14  ;;  %vm445_vm2 = vweird.f32 %v1147_v15 }
 0x474   :  { %vm446_vm4 = vmor %vm444_vm3, %vm445_vm2 }
 0x475   :  { %v441_v17 = vsub.f32 1.0, %v440_v16 }
 0x477   :  { %v442_v18 = vmul.f32 %v1147_v15, %v441_v17 }
 0x479   :  { %v443_v19 = vadd.f32 %v1147_v15, %v442_v18 }
 0x47b   :  { %v447_v22 = vsel %vm446_vm4, %v1147_v15, %v443_v19 }
 0x47c   :  { %v452_v25 = vsel %vm449_vm5, %v451_v23, %v447_v22 }
 0x47d   :  { %v470_v28 = vmul.f32 %v452_v25, %v1470_v42 }
 0x4da   :  { %v473_v24 = vpop.permute.xlu0 %472 }
 0x4db   :  { %v475_v27 = vmul.f32 %v473_v24, %v452_v25 }
 0x4dd   :  { %477 = vrot.lane.b32.xlu1 %v475_v27, %s1215_s3 }
 0x54f   :  { %v478_v29 = vpop.permute.xlu1 %477 }
 0x550   :  { %v1491_v30 = vadd.f32 %v478_v29, %v470_v28 }
 0x552   :  { %1148 = vtanh.f32 %v1491_v30 }
 0x553   :  { %1150 = vpow2.f32 %v1070_v32 }
 0x558   :  { %v1149_v31 = vpop.eup %1148 }
 0x559   :  { %483 = vrot.lane.b32.xlu2 %v1149_v31, %s1215_s3  ;;  %v1151_v33 = vpop.eup %1150  ;;  %v585_v31 = vld [vmem:[#allocation2 + $0x8] sm:$0x3] }
 0x55a   :  { %v438_v34 = vadd.f32 1.0, %v1151_v33 }
 0x55c   :  { %1152 = vrcp.f32 %v438_v34  ;;  %v465_v42 = vand.u32 2147483648, %v438_v34  ;;  %vm459_vm7 = vweird.f32 %v438_v34  ;;  %v463_v43 = vand.u32 2147483647, %v438_v34 }
 0x55e   :  { %v466_v46 = vor.u32 1.1754944e-38, %v465_v42  ;;  %vm464_vm11 = vcmp.eq.f32.partialorder %v463_v43, 8.507059e+37 }
 0x562   :  { %v1153_v36 = vpop.eup %1152 }
 0x563   :  { %v455_v38 = vmul.f32 %v1153_v36, %v438_v34  ;;  %vm460_vm6 = vweird.f32 %v1153_v36 }
 0x564   :  { %vm461_vm10 = vmor %vm459_vm7, %vm460_vm6 }
 0x565   :  { %v456_v39 = vsub.f32 1.0, %v455_v38 }
 0x567   :  { %v457_v40 = vmul.f32 %v1153_v36, %v456_v39  ;;  %v584_v39 = vld [vmem:[#allocation2 + $0x18] sm:$0x3] }
 0x569   :  { %v458_v41 = vadd.f32 %v1153_v36, %v457_v40 }
 0x56b   :  { %v462_v44 = vsel %vm461_vm10, %v1153_v36, %v458_v41 }
 0x56c   :  { %v467_v47 = vsel %vm464_vm11, %v466_v46, %v462_v44 }
 0x5b3   :  { %v484_v48 = vpop.permute.xlu2 %483 }
 0x5b4   :  { %v486_v49 = vmul.f32 %v484_v48, %v467_v47 }
 0x5b6   :  { %487 = vst.msk [vmem:[%s1569_s4 + $0x4] sm:$0x3] %vm296_vm8, %v486_v49  ;;  %v488_v50 = vpack.c.bf16 %v486_v49, %v486_v49 }
 0x5b8   :  { %1071 = vmatmul.msk.bf16.vlgmr.msra.gmra.mxu2 %vm210_vm9, %v488_v50  ;;  %1072 = vmatmul.msk.bf16.vlgmr.msra.gmra.mxu3 %vm210_vm9, %v488_v50 }
 0x5b9   :  { %891 = vmatpush.bf16.msra.mxu3 %v1265_v10  ;;  %878 = vmatpush.bf16.msra.mxu2 %v1327_v35 }
 0x5bd   :  { %892 = vmatpush.bf16.msra.mxu3 %v1274_v13  ;;  %879 = vmatpush.bf16.msra.mxu2 %v1351_v45  ;;  %v489_v13 = vld [vmem:[#allocation2 + $0x10] sm:$0xc0] }
 0x5be   :  { %v493_v45 = vrot.slane %v489_v13, 6 }
 0x5c1   :  { %893 = vmatpush.bf16.msra.mxu3 %v1307_v26  ;;  %880 = vmatpush.bf16.msra.mxu2 %v1373_v54 }
 0x5c5   :  { %894 = vmatpush.bf16.msra.mxu3 %v1333_v37  ;;  %881 = vmatpush.bf16.msra.mxu2 %v1395_v0 }
 0x63b   :  { %v509_v53 = vpop.f32.mrf.mxu2  ;;  %v522_v55 = vpop.f32.mrf.mxu3 }
 0x63c   :  { %v523_v56 = vadd.f32 %v522_v55, %v494_v52  ;;  %v510_v26 = vadd.f32 %v509_v53, %v493_v45 }
 0x63e   :  { %1154 = vtanh.f32 %v523_v56  ;;  %v1073_v58 = vmul.f32 -1.442695, %v510_v26  ;;  %v1074_v12 = vmul.f32 -1.442695, %v523_v56 }
 0x640   :  { %1156 = vpow2.f32 %v1073_v58 }
 0x643   :  { %v511_v10 = vpop.f32.mrf.mxu2  ;;  %v524_v35 = vpop.f32.mrf.mxu3 }
 0x644   :  { %v1155_v57 = vpop.eup %1154 }
 0x645   :  { %567 = vrot.lane.b32.xlu0 %v1155_v57, %s1215_s3 }
 0x646   :  { %v1157_v54 = vpop.eup %1156 }
 0x647   :  { %v532_v37 = vadd.f32 1.0, %v1157_v54 }
 0x649   :  { %1158 = vrcp.f32 %v532_v37  ;;  %v545_v63 = vand.u32 2147483648, %v532_v37  ;;  %vm539_vm13 = vweird.f32 %v532_v37  ;;  %v543_v1 = vand.u32 2147483647, %v532_v37 }
 0x64b   :  { %v546_v3 = vor.u32 1.1754944e-38, %v545_v63  ;;  %vm544_vm15 = vcmp.eq.f32.partialorder %v543_v1, 8.507059e+37 }
 0x64f   :  { %v1159_v0 = vpop.eup %1158 }
 0x650   :  { %v535_v59 = vmul.f32 %v1159_v0, %v532_v37  ;;  %vm540_vm12 = vweird.f32 %v1159_v0 }
 0x651   :  { %vm541_vm14 = vmor %vm539_vm13, %vm540_vm12 }
 0x652   :  { %v536_v60 = vsub.f32 1.0, %v535_v59 }
 0x654   :  { %v537_v61 = vmul.f32 %v1159_v0, %v536_v60 }
 0x656   :  { %v538_v62 = vadd.f32 %v1159_v0, %v537_v61 }
 0x658   :  { %v542_v2 = vsel %vm541_vm14, %v1159_v0, %v538_v62 }
 0x659   :  { %v547_v5 = vsel %vm544_vm15, %v546_v3, %v542_v2 }
 0x65a   :  { %v565_v7 = vmul.f32 %v547_v5, %v1491_v30 }
 0x6b7   :  { %v568_v4 = vpop.permute.xlu0 %567 }
 0x6b8   :  { %v570_v6 = vmul.f32 %v568_v4, %v547_v5 }
 0x6ba   :  { %572 = vrot.lane.b32.xlu1 %v570_v6, %s1215_s3 }
 0x72c   :  { %v573_v8 = vpop.permute.xlu1 %572 }
 0x72d   :  { %v575_v9 = vadd.f32 %v573_v8, %v565_v7  ;;  %v674_v7 = vld [vmem:[#allocation2 + $0x8] sm:$0xc] }
 0x72e   :  { %v678_v8 = vrot.slane %v674_v7, 2 }
 0x72f   :  { %1160 = vtanh.f32 %v575_v9 }
 0x730   :  { %1162 = vpow2.f32 %v1074_v12 }
 0x735   :  { %v1161_v11 = vpop.eup %1160 }
 0x736   :  { %578 = vrot.lane.b32.xlu2 %v1161_v11, %s1215_s3  ;;  %v1163_v14 = vpop.eup %1162 }
 0x737   :  { %v533_v15 = vadd.f32 1.0, %v1163_v14 }
 0x739   :  { %1164 = vrcp.f32 %v533_v15  ;;  %v560_v21 = vand.u32 2147483648, %v533_v15  ;;  %vm554_vm1 = vweird.f32 %v533_v15  ;;  %v558_v22 = vand.u32 2147483647, %v533_v15 }
 0x73b   :  { %v561_v24 = vor.u32 1.1754944e-38, %v560_v21  ;;  %vm559_vm3 = vcmp.eq.f32.partialorder %v558_v22, 8.507059e+37 }
 0x73f   :  { %v1165_v16 = vpop.eup %1164 }
 0x740   :  { %v550_v17 = vmul.f32 %v1165_v16, %v533_v15  ;;  %vm555_vm0 = vweird.f32 %v1165_v16 }
 0x741   :  { %vm556_vm2 = vmor %vm554_vm1, %vm555_vm0 }
 0x742   :  { %v551_v18 = vsub.f32 1.0, %v550_v17  ;;  %v673_v17 = vld [vmem:[#allocation2 + $0x18] sm:$0xc] }
 0x744   :  { %v552_v19 = vmul.f32 %v1165_v16, %v551_v18  ;;  %v677_v18 = vrot.slane %v673_v17, 2 }
 0x746   :  { %v553_v20 = vadd.f32 %v1165_v16, %v552_v19 }
 0x748   :  { %v557_v23 = vsel %vm556_vm2, %v1165_v16, %v553_v20 }
 0x749   :  { %v562_v25 = vsel %vm559_vm3, %v561_v24, %v557_v23 }
 0x790   :  { %v579_v27 = vpop.permute.xlu2 %578 }
 0x791   :  { %v581_v28 = vmul.f32 %v579_v27, %v562_v25 }
 0x793   :  { %582 = vst.msk [vmem:[%s1569_s4 + $0x6] sm:$0x3] %vm296_vm8, %v581_v28  ;;  %v583_v29 = vpack.c.bf16 %v581_v28, %v581_v28 }
 0x795   :  { %1075 = vmatmul.msk.bf16.vlgmr.msra.gmra.mxu0 %vm210_vm9, %v583_v29  ;;  %1076 = vmatmul.msk.bf16.vlgmr.msra.gmra.mxu1 %vm210_vm9, %v583_v29 }
 0x812   :  { %v598_v30 = vpop.f32.mrf.mxu0  ;;  %v611_v32 = vpop.f32.mrf.mxu1 }
 0x813   :  { %v612_v33 = vadd.f32 %v611_v32, %v585_v31  ;;  %v599_v40 = vadd.f32 %v598_v30, %v584_v39 }
 0x815   :  { %1166 = vtanh.f32 %v612_v33  ;;  %v1077_v41 = vmul.f32 -1.442695, %v599_v40  ;;  %v1078_v26 = vmul.f32 -1.442695, %v612_v33 }
 0x817   :  { %1168 = vpow2.f32 %v1077_v41 }
 0x81a   :  { %v600_v34 = vpop.f32.mrf.mxu0  ;;  %v613_v36 = vpop.f32.mrf.mxu1 }
 0x81b   :  { %v1167_v38 = vpop.eup %1166 }
 0x81c   :  { %656 = vrot.lane.b32.xlu0 %v1167_v38, %s1215_s3 }
 0x81d   :  { %v1169_v42 = vpop.eup %1168 }
 0x81e   :  { %v621_v43 = vadd.f32 1.0, %v1169_v42 }
 0x820   :  { %1170 = vrcp.f32 %v621_v43  ;;  %v634_v50 = vand.u32 2147483648, %v621_v43  ;;  %vm628_vm5 = vweird.f32 %v621_v43  ;;  %v632_v51 = vand.u32 2147483647, %v621_v43 }
 0x822   :  { %v635_v53 = vor.u32 1.1754944e-38, %v634_v50  ;;  %vm633_vm7 = vcmp.eq.f32.partialorder %v632_v51, 8.507059e+37 }
 0x826   :  { %v1171_v44 = vpop.eup %1170 }
 0x827   :  { %v624_v46 = vmul.f32 %v1171_v44, %v621_v43  ;;  %vm629_vm4 = vweird.f32 %v1171_v44 }
 0x828   :  { %vm630_vm6 = vmor %vm628_vm5, %vm629_vm4 }
 0x829   :  { %v625_v47 = vsub.f32 1.0, %v624_v46 }
 0x82b   :  { %v626_v48 = vmul.f32 %v1171_v44, %v625_v47 }
 0x82d   :  { %v627_v49 = vadd.f32 %v1171_v44, %v626_v48 }
 0x82f   :  { %v631_v52 = vsel %vm630_vm6, %v1171_v44, %v627_v49 }
 0x830   :  { %v636_v56 = vsel %vm633_vm7, %v635_v53, %v631_v52 }
 0x831   :  { %v654_v35 = vmul.f32 %v636_v56, %v575_v9 }
 0x88e   :  { %v657_v55 = vpop.permute.xlu0 %656 }
 0x88f   :  { %v659_v10 = vmul.f32 %v657_v55, %v636_v56 }
 0x891   :  { %661 = vrot.lane.b32.xlu1 %v659_v10, %s1215_s3 }
 0x903   :  { %v662_v57 = vpop.permute.xlu1 %661 }
 0x904   :  { %v1521_v13 = vadd.f32 %v662_v57, %v654_v35 }
 0x906   :  { %1172 = vtanh.f32 %v1521_v13 }
 0x907   :  { %1174 = vpow2.f32 %v1078_v26 }
 0x90c   :  { %v1173_v45 = vpop.eup %1172 }
 0x90d   :  { %667 = vrot.lane.b32.xlu2 %v1173_v45, %s1215_s3  ;;  %v1175_v58 = vpop.eup %1174 }
 0x90e   :  { %v622_v54 = vadd.f32 1.0, %v1175_v58 }
 0x910   :  { %1176 = vrcp.f32 %v622_v54  ;;  %v649_v62 = vand.u32 2147483648, %v622_v54  ;;  %vm643_vm11 = vweird.f32 %v622_v54  ;;  %v647_v63 = vand.u32 2147483647, %v622_v54 }
 0x912   :  { %v650_v2 = vor.u32 1.1754944e-38, %v649_v62  ;;  %vm648_vm13 = vcmp.eq.f32.partialorder %v647_v63, 8.507059e+37 }
 0x916   :  { %v1177_v37 = vpop.eup %1176 }
 0x917   :  { %v639_v0 = vmul.f32 %v1177_v37, %v622_v54  ;;  %vm644_vm10 = vweird.f32 %v1177_v37 }
 0x918   :  { %vm645_vm12 = vmor %vm643_vm11, %vm644_vm10 }
 0x919   :  { %v640_v59 = vsub.f32 1.0, %v639_v0 }
 0x91b   :  { %v641_v60 = vmul.f32 %v1177_v37, %v640_v59 }
 0x91d   :  { %v642_v61 = vadd.f32 %v1177_v37, %v641_v60  ;;  %v768_v60 = vld [vmem:[#allocation2 + $0x18] sm:$0x30] }
 0x91f   :  { %v646_v1 = vsel %vm645_vm12, %v1177_v37, %v642_v61  ;;  %v772_v61 = vrot.slane %v768_v60, 4 }
 0x920   :  { %v651_v3 = vsel %vm648_vm13, %v650_v2, %v646_v1 }
 0x967   :  { %v668_v4 = vpop.permute.xlu2 %667 }
 0x968   :  { %v670_v5 = vmul.f32 %v668_v4, %v651_v3 }
 0x96a   :  { %671 = vst.msk [vmem:[%s1569_s4 + $0x8] sm:$0x3] %vm296_vm8, %v670_v5  ;;  %v672_v6 = vpack.c.bf16 %v670_v5, %v670_v5 }
 0x96c   :  { %1079 = vmatmul.msk.bf16.vlgmr.msrb.gmra.mxu2 %vm210_vm9, %v672_v6  ;;  %1080 = vmatmul.msk.bf16.vlgmr.msrb.gmra.mxu3 %vm210_vm9, %v672_v6 }
 0x9ef   :  { %v693_v9 = vpop.f32.mrf.mxu2  ;;  %v706_v11 = vpop.f32.mrf.mxu3 }
 0x9f0   :  { %v707_v12 = vadd.f32 %v706_v11, %v678_v8  ;;  %v694_v19 = vadd.f32 %v693_v9, %v677_v18 }
 0x9f2   :  { %1178 = vtanh.f32 %v707_v12  ;;  %v1081_v20 = vmul.f32 -1.442695, %v694_v19  ;;  %v1082_v42 = vmul.f32 -1.442695, %v707_v12 }
 0x9f4   :  { %1180 = vpow2.f32 %v1081_v20 }
 0x9f7   :  { %v695_v14 = vpop.f32.mrf.mxu2  ;;  %v708_v15 = vpop.f32.mrf.mxu3 }
 0x9f8   :  { %v1179_v16 = vpop.eup %1178 }
 0x9f9   :  { %751 = vrot.lane.b32.xlu0 %v1179_v16, %s1215_s3 }
 0x9fa   :  { %v1181_v21 = vpop.eup %1180 }
 0x9fb   :  { %v716_v22 = vadd.f32 1.0, %v1181_v21 }
 0x9fd   :  { %1182 = vrcp.f32 %v716_v22  ;;  %v729_v29 = vand.u32 2147483648, %v716_v22  ;;  %vm723_vm15 = vweird.f32 %v716_v22  ;;  %v727_v30 = vand.u32 2147483647, %v716_v22 }
 0x9ff   :  { %v730_v32 = vor.u32 1.1754944e-38, %v729_v29  ;;  %vm728_vm1 = vcmp.eq.f32.partialorder %v727_v30, 8.507059e+37 }
 0xa03   :  { %v1183_v23 = vpop.eup %1182 }
 0xa04   :  { %v719_v24 = vmul.f32 %v1183_v23, %v716_v22  ;;  %vm724_vm14 = vweird.f32 %v1183_v23 }
 0xa05   :  { %vm725_vm0 = vmor %vm723_vm15, %vm724_vm14 }
 0xa06   :  { %v720_v25 = vsub.f32 1.0, %v719_v24 }
 0xa08   :  { %v721_v27 = vmul.f32 %v1183_v23, %v720_v25 }
 0xa0a   :  { %v722_v28 = vadd.f32 %v1183_v23, %v721_v27 }
 0xa0c   :  { %v726_v31 = vsel %vm725_vm0, %v1183_v23, %v722_v28 }
 0xa0d   :  { %v731_v34 = vsel %vm728_vm1, %v730_v32, %v726_v31 }
 0xa0e   :  { %v749_v38 = vmul.f32 %v731_v34, %v1521_v13  ;;  %v769_v13 = vld [vmem:[#allocation2 + $0x8] sm:$0x30] }
 0xa0f   :  { %v773_v45 = vrot.slane %v769_v13, 4 }
 0xa6b   :  { %v752_v33 = vpop.permute.xlu0 %751 }
 0xa6c   :  { %v754_v36 = vmul.f32 %v752_v33, %v731_v34 }
 0xa6e   :  { %756 = vrot.lane.b32.xlu1 %v754_v36, %s1215_s3 }
 0xae0   :  { %v757_v39 = vpop.permute.xlu1 %756 }
 0xae1   :  { %v1534_v40 = vadd.f32 %v757_v39, %v749_v38 }
 0xae3   :  { %1184 = vtanh.f32 %v1534_v40 }
 0xae4   :  { %1186 = vpow2.f32 %v1082_v42 }
 0xae9   :  { %v1185_v41 = vpop.eup %1184 }
 0xaea   :  { %762 = vrot.lane.b32.xlu2 %v1185_v41, %s1215_s3  ;;  %v1187_v43 = vpop.eup %1186 }
 0xaeb   :  { %v717_v44 = vadd.f32 1.0, %v1187_v43 }
 0xaed   :  { %1188 = vrcp.f32 %v717_v44  ;;  %v744_v51 = vand.u32 2147483648, %v717_v44  ;;  %vm738_vm3 = vweird.f32 %v717_v44  ;;  %v742_v52 = vand.u32 2147483647, %v717_v44 }
 0xaef   :  { %v745_v55 = vor.u32 1.1754944e-38, %v744_v51  ;;  %vm743_vm5 = vcmp.eq.f32.partialorder %v742_v52, 8.507059e+37 }
 0xaf3   :  { %v1189_v46 = vpop.eup %1188 }
 0xaf4   :  { %v734_v47 = vmul.f32 %v1189_v46, %v717_v44  ;;  %vm739_vm2 = vweird.f32 %v1189_v46 }
 0xaf5   :  { %vm740_vm4 = vmor %vm738_vm3, %vm739_vm2 }
 0xaf6   :  { %v735_v48 = vsub.f32 1.0, %v734_v47 }
 0xaf8   :  { %v736_v49 = vmul.f32 %v1189_v46, %v735_v48 }
 0xafa   :  { %v737_v50 = vadd.f32 %v1189_v46, %v736_v49  ;;  %v863_v49 = vld [vmem:[#allocation2 + $0x18] sm:$0xc0] }
 0xafc   :  { %v741_v53 = vsel %vm740_vm4, %v1189_v46, %v737_v50  ;;  %v867_v50 = vrot.slane %v863_v49, 6 }
 0xafd   :  { %v746_v56 = vsel %vm743_vm5, %v745_v55, %v741_v53 }
 0xb44   :  { %v763_v10 = vpop.permute.xlu2 %762 }
 0xb45   :  { %v765_v35 = vmul.f32 %v763_v10, %v746_v56 }
 0xb47   :  { %766 = vst.msk [vmem:[%s1569_s4 + $0xa] sm:$0x3] %vm296_vm8, %v765_v35  ;;  %v767_v57 = vpack.c.bf16 %v765_v35, %v765_v35 }
 0xb49   :  { %1083 = vmatmul.msk.bf16.vlgmr.msrb.gmra.mxu0 %vm210_vm9, %v767_v57  ;;  %1084 = vmatmul.msk.bf16.vlgmr.msrb.gmra.mxu1 %vm210_vm9, %v767_v57 }
 0xbc6   :  { %v788_v26 = vpop.f32.mrf.mxu0  ;;  %v801_v58 = vpop.f32.mrf.mxu1 }
 0xbc7   :  { %v802_v54 = vadd.f32 %v801_v58, %v773_v45  ;;  %v789_v62 = vadd.f32 %v788_v26, %v772_v61 }
 0xbc9   :  { %1190 = vtanh.f32 %v802_v54  ;;  %v1085_v63 = vmul.f32 -1.442695, %v789_v62  ;;  %v1086_v21 = vmul.f32 -1.442695, %v802_v54 }
 0xbcb   :  { %1192 = vpow2.f32 %v1085_v63 }
 0xbce   :  { %v790_v37 = vpop.f32.mrf.mxu0  ;;  %v803_v0 = vpop.f32.mrf.mxu1 }
 0xbcf   :  { %v1191_v59 = vpop.eup %1190 }
 0xbd0   :  { %846 = vrot.lane.b32.xlu0 %v1191_v59, %s1215_s3 }
 0xbd1   :  { %v1193_v1 = vpop.eup %1192 }
 0xbd2   :  { %v811_v2 = vadd.f32 1.0, %v1193_v1 }
 0xbd4   :  { %1194 = vrcp.f32 %v811_v2  ;;  %v824_v8 = vand.u32 2147483648, %v811_v2  ;;  %vm818_vm7 = vweird.f32 %v811_v2  ;;  %v822_v9 = vand.u32 2147483647, %v811_v2 }
 0xbd6   :  { %v825_v12 = vor.u32 1.1754944e-38, %v824_v8  ;;  %vm823_vm11 = vcmp.eq.f32.partialorder %v822_v9, 8.507059e+37 }
 0xbda   :  { %v1195_v3 = vpop.eup %1194 }
 0xbdb   :  { %v814_v4 = vmul.f32 %v1195_v3, %v811_v2  ;;  %vm819_vm6 = vweird.f32 %v1195_v3 }
 0xbdc   :  { %vm820_vm10 = vmor %vm818_vm7, %vm819_vm6 }
 0xbdd   :  { %v815_v5 = vsub.f32 1.0, %v814_v4 }
 0xbdf   :  { %v816_v6 = vmul.f32 %v1195_v3, %v815_v5 }
 0xbe1   :  { %v817_v7 = vadd.f32 %v1195_v3, %v816_v6 }
 0xbe3   :  { %v821_v11 = vsel %vm820_vm10, %v1195_v3, %v817_v7 }
 0xbe4   :  { %v826_v15 = vsel %vm823_vm11, %v825_v12, %v821_v11 }
 0xbe5   :  { %v844_v17 = vmul.f32 %v826_v15, %v1534_v40  ;;  %v864_v40 = vld [vmem:[#allocation2 + $0x8] sm:$0xc0] }
 0xbe6   :  { %v868_v41 = vrot.slane %v864_v40, 6 }
 0xc42   :  { %v847_v14 = vpop.permute.xlu0 %846 }
 0xc43   :  { %v849_v16 = vmul.f32 %v847_v14, %v826_v15 }
 0xc45   :  { %851 = vrot.lane.b32.xlu1 %v849_v16, %s1215_s3 }
 0xcb7   :  { %v852_v18 = vpop.permute.xlu1 %851 }
 0xcb8   :  { %v1547_v19 = vadd.f32 %v852_v18, %v844_v17 }
 0xcba   :  { %1196 = vtanh.f32 %v1547_v19 }
 0xcbb   :  { %1198 = vpow2.f32 %v1086_v21 }
 0xcc0   :  { %v1197_v20 = vpop.eup %1196 }
 0xcc1   :  { %857 = vrot.lane.b32.xlu2 %v1197_v20, %s1215_s3  ;;  %v1199_v22 = vpop.eup %1198 }
 0xcc2   :  { %v812_v23 = vadd.f32 1.0, %v1199_v22 }
 0xcc4   :  { %1200 = vrcp.f32 %v812_v23  ;;  %v839_v30 = vand.u32 2147483648, %v812_v23  ;;  %vm833_vm13 = vweird.f32 %v812_v23  ;;  %v837_v31 = vand.u32 2147483647, %v812_v23 }
 0xcc6   :  { %v840_v33 = vor.u32 1.1754944e-38, %v839_v30  ;;  %vm838_vm15 = vcmp.eq.f32.partialorder %v837_v31, 8.507059e+37 }
 0xcca   :  { %v1201_v24 = vpop.eup %1200 }
 0xccb   :  { %v829_v25 = vmul.f32 %v1201_v24, %v812_v23  ;;  %vm834_vm12 = vweird.f32 %v1201_v24 }
 0xccc   :  { %vm835_vm14 = vmor %vm833_vm13, %vm834_vm12 }
 0xccd   :  { %v830_v27 = vsub.f32 1.0, %v829_v25 }
 0xccf   :  { %v831_v28 = vmul.f32 %v1201_v24, %v830_v27 }
 0xcd1   :  { %v832_v29 = vadd.f32 %v1201_v24, %v831_v28 }
 0xcd3   :  { %v836_v32 = vsel %vm835_vm14, %v1201_v24, %v832_v29 }
 0xcd4   :  { %v841_v34 = vsel %vm838_vm15, %v840_v33, %v836_v32 }
 0xd1b   :  { %v858_v36 = vpop.permute.xlu2 %857 }
 0xd1c   :  { %v860_v38 = vmul.f32 %v858_v36, %v841_v34 }
 0xd1e   :  { %861 = vst.msk [vmem:[%s1569_s4 + $0xc] sm:$0x3] %vm296_vm8, %v860_v38  ;;  %v862_v39 = vpack.c.bf16 %v860_v38, %v860_v38 }
 0xd20   :  { %1087 = vmatmul.msk.bf16.vlgmr.msra.gmra.mxu2 %vm210_vm9, %v862_v39  ;;  %1088 = vmatmul.msk.bf16.vlgmr.msra.gmra.mxu3 %vm210_vm9, %v862_v39 }
 0xda3   :  { %v883_v42 = vpop.f32.mrf.mxu2  ;;  %v896_v43 = vpop.f32.mrf.mxu3 }
 0xda4   :  { %v897_v44 = vadd.f32 %v896_v43, %v868_v41  ;;  %v884_v51 = vadd.f32 %v883_v42, %v867_v50 }
 0xda6   :  { %1202 = vtanh.f32 %v897_v44  ;;  %v1089_v52 = vmul.f32 -1.442695, %v884_v51  ;;  %v1090_v1 = vmul.f32 -1.442695, %v897_v44 }
 0xda8   :  { %1204 = vpow2.f32 %v1089_v52 }
 0xdab   :  { %v885_v46 = vpop.f32.mrf.mxu2  ;;  %v898_v47 = vpop.f32.mrf.mxu3 }
 0xdac   :  { %v1203_v48 = vpop.eup %1202 }
 0xdad   :  { %941 = vrot.lane.b32.xlu0 %v1203_v48, %s1215_s3 }
 0xdae   :  { %v1205_v53 = vpop.eup %1204 }
 0xdaf   :  { %v906_v55 = vadd.f32 1.0, %v1205_v53 }
 0xdb1   :  { %1206 = vrcp.f32 %v906_v55  ;;  %v919_v45 = vand.u32 2147483648, %v906_v55  ;;  %vm913_vm0 = vweird.f32 %v906_v55  ;;  %v917_v26 = vand.u32 2147483647, %v906_v55 }
 0xdb3   :  { %v920_v54 = vor.u32 1.1754944e-38, %v919_v45  ;;  %vm918_vm2 = vcmp.eq.f32.partialorder %v917_v26, 8.507059e+37 }
 0xdb7   :  { %v1207_v56 = vpop.eup %1206 }
 0xdb8   :  { %v909_v10 = vmul.f32 %v1207_v56, %v906_v55  ;;  %vm914_vm9 = vweird.f32 %v1207_v56 }
 0xdb9   :  { %vm915_vm1 = vmor %vm913_vm0, %vm914_vm9 }
 0xdba   :  { %v910_v35 = vsub.f32 1.0, %v909_v10 }
 0xdbc   :  { %v911_v57 = vmul.f32 %v1207_v56, %v910_v35 }
 0xdbe   :  { %v912_v13 = vadd.f32 %v1207_v56, %v911_v57 }
 0xdc0   :  { %v916_v58 = vsel %vm915_vm1, %v1207_v56, %v912_v13 }
 0xdc1   :  { %v921_v0 = vsel %vm918_vm2, %v920_v54, %v916_v58 }
 0xdc2   :  { %v939_v60 = vmul.f32 %v921_v0, %v1547_v19 }
 0xe1f   :  { %v942_v37 = vpop.permute.xlu0 %941 }
 0xe20   :  { %v944_v59 = vmul.f32 %v942_v37, %v921_v0 }
 0xe22   :  { %946 = vrot.lane.b32.xlu1 %v944_v59, %s1215_s3 }
 0xe94   :  { %v947_v61 = vpop.permute.xlu1 %946 }
 0xe95   :  { %v949_v62 = vadd.f32 %v947_v61, %v939_v60 }
 0xe97   :  { %1208 = vtanh.f32 %v949_v62 }
 0xe98   :  { %1210 = vpow2.f32 %v1090_v1 }
 0xe9d   :  { %v1209_v63 = vpop.eup %1208 }
 0xe9e   :  { %952 = vrot.lane.b32.xlu2 %v1209_v63, %s1215_s3  ;;  %v1211_v2 = vpop.eup %1210 }
 0xe9f   :  { %v907_v3 = vadd.f32 1.0, %v1211_v2 }
 0xea1   :  { %1212 = vrcp.f32 %v907_v3  ;;  %v934_v9 = vand.u32 2147483648, %v907_v3  ;;  %vm928_vm4 = vweird.f32 %v907_v3  ;;  %v932_v11 = vand.u32 2147483647, %v907_v3 }
 0xea3   :  { %v935_v14 = vor.u32 1.1754944e-38, %v934_v9  ;;  %vm933_vm6 = vcmp.eq.f32.partialorder %v932_v11, 8.507059e+37 }
 0xea7   :  { %v1213_v4 = vpop.eup %1212 }
 0xea8   :  { %v924_v5 = vmul.f32 %v1213_v4, %v907_v3  ;;  %vm929_vm3 = vweird.f32 %v1213_v4 }
 0xea9   :  { %vm930_vm5 = vmor %vm928_vm4, %vm929_vm3 }
 0xeaa   :  { %v925_v6 = vsub.f32 1.0, %v924_v5 }
 0xeac   :  { %v926_v7 = vmul.f32 %v1213_v4, %v925_v6 }
 0xeae   :  { %v927_v8 = vadd.f32 %v1213_v4, %v926_v7 }
 0xeb0   :  { %v931_v12 = vsel %vm930_vm5, %v1213_v4, %v927_v8 }
 0xeb1   :  { %v936_v15 = vsel %vm933_vm6, %v935_v14, %v931_v12 }
 0xef8   :  { %v953_v16 = vpop.permute.xlu2 %952 }
 0xef9   :  { %v955_v17 = vmul.f32 %v953_v16, %v936_v15 }
 0xefb   :  { %956 = vst.msk [vmem:[%s1569_s4 + $0xe] sm:$0x3] %vm296_vm8, %v955_v17 }

</bundles_post_ra>
